<compile_context>
chip_gen: v5e
topology: v5e:2x2
jax: 0.10.0
libtpu: 0.0.40
codegen_flags: <defaults>
</compile_context>

<pallas_src>
import jax
import jax.numpy as jnp
from jax.experimental import pallas as pl
from jax.experimental.pallas import tpu as pltpu  # noqa: F401  (TPU backend)

# ---------------- model hyper-parameters ----------------
DIM = 4                      # input / output channels ("dim")
HEADS = 4
DIM_HEAD = 32
HIDDEN = HEADS * DIM_HEAD    # 128
SCALE = DIM_HEAD ** (-0.5)
GN_EPS = 1e-5

B = 2
H_SP = 8
W_SP = 8
N = H_SP * W_SP              # 64 spatial positions
BN = B * N                   # 128 packed lanes (== HIDDEN, so masks stack)


def linear_attention_kernel(x_ref, wqkv_ref, wout_ref, affine_ref, masks_ref,
                            o_ref):
    """Single invocation, no grid.  Layouts (channels on sublanes, batch*spatial
    packed on the 128-lane axis):

      x_ref      : (C, B*N)        both samples packed on lanes
      wqkv_ref   : (C, 3*HIDDEN)   lane-dense qkv weight (torch weight^T)
      wout_ref   : (C, HIDDEN)     to_out conv weight, pre-scaled by SCALE
      affine_ref : (C, 3)          [:,0]=to_out bias, [:,1]=gn weight, [:,2]=gn bias
      masks_ref  : (2, 128, 128)   [0]=head_ones (32-blocks), [1]=batch_ones (64-blocks)
      o_ref      : (C, B*N)
    """
    x = x_ref[...].astype(jnp.float32)                       # (C, BN)
    wqkv = wqkv_ref[...].astype(jnp.float32)                 # (C, 3H)
    wout = wout_ref[...].astype(jnp.float32)                 # (C, H)
    affine = affine_ref[...].astype(jnp.float32)             # (C, 3)
    bout = affine[:, 0:1]                                    # (C, 1)
    gnw = affine[:, 1:2]                                     # (C, 1)
    gnb = affine[:, 2:3]                                     # (C, 1)
    head_ones = masks_ref[0]                                 # (H, H)   0/1
    batch_ones = masks_ref[1]                                # (BN, BN) 0/1

    # Per-sample lane masks: row 0 of batch_ones is [1]*N ++ [0]*N  (B == 2).
    mask0 = batch_ones[0:1, :]                               # (1, BN)
    mask1 = 1.0 - mask0                                      # (1, BN)

    # 1x1 conv == channel matmul, contracting the tiny C axis (lane-dense W^T):
    #   qkv[d, n] = sum_c W[d, c] * x[c, n]
    qkv = jax.lax.dot_general(wqkv, x, (((0,), (0,)), ((), ())),
                              preferred_element_type=jnp.float32)  # (3H, BN)
    q = qkv[0:HIDDEN]                                        # (H, BN)
    k = qkv[HIDDEN:2 * HIDDEN]                               # (H, BN)
    v = qkv[2 * HIDDEN:3 * HIDDEN]                           # (H, BN)

    # --- q.softmax over the 32 channels of each head (sublane segments) ---
    # Subtracting the per-lane max over all 128 channels is a constant shift
    # within every head segment, so each per-head softmax stays exact.
    q = q - jnp.max(q, axis=0, keepdims=True)
    eq = jnp.exp(q)
    seg_sum = jnp.dot(head_ones, eq, preferred_element_type=jnp.float32)
    qn = eq * pl.reciprocal(seg_sum, approx=True)            # scale folded into wout

    # --- k.softmax over the N positions of each sample (lane segments) ---
    # Row max over all 128 lanes is a constant shift within each 64-lane
    # sample segment, so the per-sample softmax stays exact.
    k = k - jnp.max(k, axis=1, keepdims=True)
    ek = jnp.exp(k)
    lane_sum = jnp.dot(ek, batch_ones, preferred_element_type=jnp.float32)
    kn = ek * pl.reciprocal(lane_sum, approx=True)

    # --- per-sample context, all heads in one matmul, head block-diag mask ---
    #   ctx_b^T[e, d] = sum_{n in sample b} v[e, n] * kn[d, n]
    kn0 = kn * mask0
    kn1 = kn - kn0
    dn_lanes = (((1,), (1,)), ((), ()))
    ctx0_t = jax.lax.dot_general(v, kn0, dn_lanes,
                                 preferred_element_type=jnp.float32) * head_ones
    ctx1_t = jax.lax.dot_general(v, kn1, dn_lanes,
                                 preferred_element_type=jnp.float32) * head_ones

    # out[e, n] = sum_d ctx_{b(n)}^T[e, d] * qn[d, n]   (lane-masked qn halves)
    qn0 = qn * mask0
    qn1 = qn - qn0
    out = (jnp.dot(ctx0_t, qn0, preferred_element_type=jnp.float32) +
           jnp.dot(ctx1_t, qn1, preferred_element_type=jnp.float32))   # (H, BN)

    # to_out 1x1 conv (weight pre-scaled by SCALE in the wrapper) + bias
    y = jnp.dot(wout, out, preferred_element_type=jnp.float32) + bout  # (C, BN)

    # GroupNorm(1, C) per sample: mean/var over the C*N entries of each 64-lane
    # segment, via two lane-masked full reductions (B == 2 samples packed).
    inv_cn = 2.0 / (y.shape[0] * y.shape[1])
    m0 = jnp.sum(y * mask0) * inv_cn
    m1 = jnp.sum(y * mask1) * inv_cn
    mean = m0 * mask0 + m1 * mask1                           # (1, BN)
    yc = y - mean
    var0 = jnp.sum(yc * yc * mask0) * inv_cn
    var1 = jnp.sum(yc * yc * mask1) * inv_cn
    inv_std = (jax.lax.rsqrt(var0 + GN_EPS) * mask0 +
               jax.lax.rsqrt(var1 + GN_EPS) * mask1)         # (1, BN)
    y = yc * inv_std * gnw + gnb

    o_ref[...] = y.astype(o_ref.dtype)                       # single lane-dense store


def _block_diag_ones(total, block):
    idx = jnp.arange(total)
    return (idx[:, None] // block == idx[None, :] // block).astype(jnp.float32)


def linear_attention_pallas(x_nchw, w_qkv, w_out, b_out, gn_w, gn_b):
    b, c, h, w = x_nchw.shape
    n = h * w
    bn = b * n
    assert b == 2, "batch-in-lanes packing below assumes B == 2"
    assert bn == HIDDEN, "mask stacking assumes B*H*W == heads*dim_head (=128)"

    # Pack both samples into the lane axis: (B, C, H, W) -> (C, B*N).  (2 KiB
    # reshape/transpose outside the kernel; everything inside is lane-dense.)
    x_packed = jnp.transpose(x_nchw.reshape(b, c, n), (1, 0, 2)).reshape(c, bn)

    # Lane-dense / merged operands (see kernel docstring).
    wqkv_cd = jnp.transpose(w_qkv, (1, 0))                    # (C, 3H)
    wout_scaled = w_out * SCALE                               # (C, H), scale folded
    affine = jnp.stack([b_out, gn_w, gn_b], axis=1)           # (C, 3)
    masks = jnp.stack([_block_diag_ones(HIDDEN, DIM_HEAD),    # head_ones
                       _block_diag_ones(bn, n)])              # batch_ones

    out_packed = pl.pallas_call(
        linear_attention_kernel,
        out_shape=jax.ShapeDtypeStruct((c, bn), x_nchw.dtype),
        # Gridless single invocation: every operand is a full-array VMEM block
        # (total working set ~160 KiB) - nothing to tile or pipeline.
    )(x_packed, wqkv_cd, wout_scaled, affine, masks)

    # (C, B*N) -> (B, C, H, W): trivial 2 KiB unpack outside the kernel.
    return jnp.transpose(out_packed.reshape(c, b, n), (1, 0, 2)).reshape(b, c, h, w)


def linear_attention_reference(x_nchw, w_qkv, w_out, b_out, gn_w, gn_b):
    """Pure-JAX reference mirroring the PyTorch forward (for verification)."""
    b, c, h, w = x_nchw.shape
    n = h * w
    x_cn = x_nchw.reshape(b, c, n)                                    # (B, C, N)
    qkv = jnp.einsum('dc,bcn->bdn', w_qkv, x_cn)                      # (B, 3H, N)
    q, k, v = jnp.split(qkv, 3, axis=1)

    def to_heads(t):  # (B, heads*d, N) -> (B, heads, d, N)  (torch layout)
        return t.reshape(b, HEADS, DIM_HEAD, n)

    q, k, v = map(to_heads, (q, k, v))
    q = jax.nn.softmax(q, axis=-2) * SCALE
    k = jax.nn.softmax(k, axis=-1)
    context = jnp.einsum('bhdn,bhen->bhde', k, v)
    out = jnp.einsum('bhde,bhdn->bhen', context, q)                   # (B, h, e, N)
    out = out.reshape(b, HIDDEN, n)                                   # (B, hidden, N)
    y = jnp.einsum('ce,ben->bcn', w_out, out) + b_out[None, :, None]  # (B, dim, N)
    mean = jnp.mean(y, axis=(1, 2), keepdims=True)
    var = jnp.mean((y - mean) ** 2, axis=(1, 2), keepdims=True)
    y = (y - mean) / jnp.sqrt(var + GN_EPS)
    y = y * gn_w[None, :, None] + gn_b[None, :, None]
    return y.reshape(b, c, h, w)


if __name__ == "__main__":
    key = jax.random.PRNGKey(0)
    kx, k1, k2, k3, k4, k5 = jax.random.split(key, 6)

    x = jax.random.normal(kx, (B, DIM, H_SP, W_SP), dtype=jnp.float32)

    # Deterministic synthetic parameters, stored in torch-native layouts:
    #   to_qkv.weight   : (3*hidden, dim, 1, 1) -> (3*hidden, dim)
    #   to_out[0].weight: (dim, hidden, 1, 1)   -> (dim, hidden)
    #   to_out[0].bias  : (dim,)
    #   to_out[1] GroupNorm(1, dim) weight/bias : (dim,)
    w_qkv = jax.random.normal(k1, (3 * HIDDEN, DIM), dtype=jnp.float32) * 0.1
    w_out = jax.random.normal(k2, (DIM, HIDDEN), dtype=jnp.float32) * 0.1
    b_out = jax.random.normal(k3, (DIM,), dtype=jnp.float32) * 0.1
    gn_w = 1.0 + 0.1 * jax.random.normal(k4, (DIM,), dtype=jnp.float32)
    gn_b = 0.1 * jax.random.normal(k5, (DIM,), dtype=jnp.float32)

    out = linear_attention_pallas(x, w_qkv, w_out, b_out, gn_w, gn_b)
    out = jax.block_until_ready(out)

    ref = linear_attention_reference(x, w_qkv, w_out, b_out, gn_w, gn_b)
    ref = jax.block_until_ready(ref)

    assert out.shape == (B, DIM, H_SP, W_SP)
    # Tolerance covers the EUP approx reciprocals (softmax denominators); all
    # matmul accumulation stays float32.
    if not jnp.allclose(out, ref, atol=2e-3, rtol=2e-3):
        raise AssertionError("Pallas kernel output does not match reference")

    print("KERNEL_OK")
</pallas_src>

<mosaic_0001>
module attributes {stable_mosaic.version = 11 : i64} {
  func.func @linear_attention_kernel(%arg0: memref<4x128xf32, #tpu.memory_space<vmem>>, %arg1: memref<4x384xf32, #tpu.memory_space<vmem>>, %arg2: memref<4x128xf32, #tpu.memory_space<vmem>>, %arg3: memref<4x3xf32, #tpu.memory_space<vmem>>, %arg4: memref<2x128x128xf32, #tpu.memory_space<vmem>>, %arg5: memref<4x128xf32, #tpu.memory_space<vmem>>) attributes {dimension_semantics = [], scalar_prefetch = 0 : i64, scratch_operands = 0 : i64, tpu.core_type = #tpu.core_type<tc>} {
    %c0 = arith.constant 0 : index
    %c0_0 = arith.constant 0 : index
    %0 = vector.load %arg0[%c0, %c0_0] : memref<4x128xf32, #tpu.memory_space<vmem>>, vector<4x128xf32>
    %c0_1 = arith.constant 0 : index
    %c0_2 = arith.constant 0 : index
    %1 = vector.load %arg1[%c0_1, %c0_2] : memref<4x384xf32, #tpu.memory_space<vmem>>, vector<4x384xf32>
    %c0_3 = arith.constant 0 : index
    %c0_4 = arith.constant 0 : index
    %2 = vector.load %arg2[%c0_3, %c0_4] : memref<4x128xf32, #tpu.memory_space<vmem>>, vector<4x128xf32>
    %c0_5 = arith.constant 0 : index
    %c0_6 = arith.constant 0 : index
    %3 = vector.load %arg3[%c0_5, %c0_6] : memref<4x3xf32, #tpu.memory_space<vmem>>, vector<4x3xf32>
    %4 = vector.extract_strided_slice %3 {offsets = [0, 0], sizes = [4, 1], strides = [1, 1]} : vector<4x3xf32> to vector<4x1xf32>
    %5 = vector.extract_strided_slice %3 {offsets = [0, 1], sizes = [4, 1], strides = [1, 1]} : vector<4x3xf32> to vector<4x1xf32>
    %6 = vector.extract_strided_slice %3 {offsets = [0, 2], sizes = [4, 1], strides = [1, 1]} : vector<4x3xf32> to vector<4x1xf32>
    %c0_7 = arith.constant 0 : index
    %c0_8 = arith.constant 0 : index
    %c0_9 = arith.constant 0 : index
    %7 = vector.load %arg4[%c0_7, %c0_8, %c0_9] : memref<2x128x128xf32, #tpu.memory_space<vmem>>, vector<1x128x128xf32>
    %8 = vector.shape_cast %7 : vector<1x128x128xf32> to vector<128x128xf32>
    %c1 = arith.constant 1 : index
    %c0_10 = arith.constant 0 : index
    %c0_11 = arith.constant 0 : index
    %9 = vector.load %arg4[%c1, %c0_10, %c0_11] : memref<2x128x128xf32, #tpu.memory_space<vmem>>, vector<1x128x128xf32>
    %10 = vector.shape_cast %9 : vector<1x128x128xf32> to vector<128x128xf32>
    %11 = vector.extract_strided_slice %10 {offsets = [0, 0], sizes = [1, 128], strides = [1, 1]} : vector<128x128xf32> to vector<1x128xf32>
    %cst = arith.constant 1.000000e+00 : f32
    %12 = vector.broadcast %cst : f32 to vector<1x128xf32>
    %13 = arith.subf %12, %11 : vector<1x128xf32>
    %cst_12 = arith.constant dense<0.000000e+00> : vector<384x128xf32>
    %14 = tpu.matmul %1, %0, %cst_12 {dimension_numbers = #tpu.dot_dimension_numbers<[0], [0], [1], [1], [0, 1, 1, 1], [], []>} : vector<4x384xf32>, vector<4x128xf32>, vector<384x128xf32> -> vector<384x128xf32>
    %15 = vector.extract_strided_slice %14 {offsets = [0, 0], sizes = [128, 128], strides = [1, 1]} : vector<384x128xf32> to vector<128x128xf32>
    %16 = vector.extract_strided_slice %14 {offsets = [128, 0], sizes = [128, 128], strides = [1, 1]} : vector<384x128xf32> to vector<128x128xf32>
    %17 = vector.extract_strided_slice %14 {offsets = [256, 0], sizes = [128, 128], strides = [1, 1]} : vector<384x128xf32> to vector<128x128xf32>
    %cst_13 = arith.constant dense<0xFF800000> : vector<128xf32>
    %18 = vector.multi_reduction <maximumf>, %15, %cst_13 [0] : vector<128x128xf32> to vector<128xf32>
    %19 = vector.shape_cast %18 : vector<128xf32> to vector<1x128xf32>
    %20 = vector.broadcast %19 : vector<1x128xf32> to vector<128x128xf32>
    %21 = arith.subf %15, %20 : vector<128x128xf32>
    %22 = math.exp %21 : vector<128x128xf32>
    %cst_14 = arith.constant dense<0.000000e+00> : vector<128x128xf32>
    %23 = tpu.matmul %8, %22, %cst_14 {dimension_numbers = #tpu.dot_dimension_numbers<[1], [0], [0], [1], [0, 0, 1, 1], [], []>} : vector<128x128xf32>, vector<128x128xf32>, vector<128x128xf32> -> vector<128x128xf32>
    %24 = tpu.reciprocal %23 {approx = true} : vector<128x128xf32> -> vector<128x128xf32>
    %25 = arith.mulf %22, %24 : vector<128x128xf32>
    %cst_15 = arith.constant dense<0xFF800000> : vector<128xf32>
    %26 = vector.multi_reduction <maximumf>, %16, %cst_15 [1] : vector<128x128xf32> to vector<128xf32>
    %27 = vector.shape_cast %26 : vector<128xf32> to vector<128x1xf32>
    %28 = vector.broadcast %27 : vector<128x1xf32> to vector<128x128xf32>
    %29 = arith.subf %16, %28 : vector<128x128xf32>
    %30 = math.exp %29 : vector<128x128xf32>
    %cst_16 = arith.constant dense<0.000000e+00> : vector<128x128xf32>
    %31 = tpu.matmul %30, %10, %cst_16 {dimension_numbers = #tpu.dot_dimension_numbers<[1], [0], [0], [1], [0, 0, 1, 1], [], []>} : vector<128x128xf32>, vector<128x128xf32>, vector<128x128xf32> -> vector<128x128xf32>
    %32 = tpu.reciprocal %31 {approx = true} : vector<128x128xf32> -> vector<128x128xf32>
    %33 = arith.mulf %30, %32 : vector<128x128xf32>
    %34 = vector.broadcast %11 : vector<1x128xf32> to vector<128x128xf32>
    %35 = arith.mulf %33, %34 : vector<128x128xf32>
    %36 = arith.subf %33, %35 : vector<128x128xf32>
    %cst_17 = arith.constant dense<0.000000e+00> : vector<128x128xf32>
    %37 = tpu.matmul %17, %35, %cst_17 {dimension_numbers = #tpu.dot_dimension_numbers<[1], [1], [0], [0], [0, 0, 1, 0], [], []>} : vector<128x128xf32>, vector<128x128xf32>, vector<128x128xf32> -> vector<128x128xf32>
    %38 = arith.mulf %37, %8 : vector<128x128xf32>
    %cst_18 = arith.constant dense<0.000000e+00> : vector<128x128xf32>
    %39 = tpu.matmul %17, %36, %cst_18 {dimension_numbers = #tpu.dot_dimension_numbers<[1], [1], [0], [0], [0, 0, 1, 0], [], []>} : vector<128x128xf32>, vector<128x128xf32>, vector<128x128xf32> -> vector<128x128xf32>
    %40 = arith.mulf %39, %8 : vector<128x128xf32>
    %41 = vector.broadcast %11 : vector<1x128xf32> to vector<128x128xf32>
    %42 = arith.mulf %25, %41 : vector<128x128xf32>
    %43 = arith.subf %25, %42 : vector<128x128xf32>
    %cst_19 = arith.constant dense<0.000000e+00> : vector<128x128xf32>
    %44 = tpu.matmul %38, %42, %cst_19 {dimension_numbers = #tpu.dot_dimension_numbers<[1], [0], [0], [1], [0, 0, 1, 1], [], []>} : vector<128x128xf32>, vector<128x128xf32>, vector<128x128xf32> -> vector<128x128xf32>
    %cst_20 = arith.constant dense<0.000000e+00> : vector<128x128xf32>
    %45 = tpu.matmul %40, %43, %cst_20 {dimension_numbers = #tpu.dot_dimension_numbers<[1], [0], [0], [1], [0, 0, 1, 1], [], []>} : vector<128x128xf32>, vector<128x128xf32>, vector<128x128xf32> -> vector<128x128xf32>
    %46 = arith.addf %44, %45 : vector<128x128xf32>
    %cst_21 = arith.constant dense<0.000000e+00> : vector<4x128xf32>
    %47 = tpu.matmul %2, %46, %cst_21 {dimension_numbers = #tpu.dot_dimension_numbers<[1], [0], [0], [1], [0, 0, 1, 1], [], []>} : vector<4x128xf32>, vector<128x128xf32>, vector<4x128xf32> -> vector<4x128xf32>
    %48 = vector.broadcast %4 : vector<4x1xf32> to vector<4x128xf32>
    %49 = arith.addf %47, %48 : vector<4x128xf32>
    %50 = vector.broadcast %11 : vector<1x128xf32> to vector<4x128xf32>
    %51 = arith.mulf %49, %50 : vector<4x128xf32>
    %52 = vector.shape_cast %51 : vector<4x128xf32> to vector<1x4x128xf32>
    %cst_22 = arith.constant dense<0.000000e+00> : vector<1xf32>
    %53 = vector.multi_reduction <add>, %52, %cst_22 [1, 2] : vector<1x4x128xf32> to vector<1xf32>
    %54 = vector.shape_cast %53 : vector<1xf32> to vector<1x1x1xf32>
    %55 = vector.extract %54[0, 0, 0] : f32 from vector<1x1x1xf32>
    %cst_23 = arith.constant 3.906250e-03 : f32
    %56 = arith.mulf %55, %cst_23 : f32
    %57 = vector.broadcast %13 : vector<1x128xf32> to vector<4x128xf32>
    %58 = arith.mulf %49, %57 : vector<4x128xf32>
    %59 = vector.shape_cast %58 : vector<4x128xf32> to vector<1x4x128xf32>
    %cst_24 = arith.constant dense<0.000000e+00> : vector<1xf32>
    %60 = vector.multi_reduction <add>, %59, %cst_24 [1, 2] : vector<1x4x128xf32> to vector<1xf32>
    %61 = vector.shape_cast %60 : vector<1xf32> to vector<1x1x1xf32>
    %62 = vector.extract %61[0, 0, 0] : f32 from vector<1x1x1xf32>
    %cst_25 = arith.constant 3.906250e-03 : f32
    %63 = arith.mulf %62, %cst_25 : f32
    %64 = vector.broadcast %56 : f32 to vector<1x128xf32>
    %65 = arith.mulf %64, %11 : vector<1x128xf32>
    %66 = vector.broadcast %63 : f32 to vector<1x128xf32>
    %67 = arith.mulf %66, %13 : vector<1x128xf32>
    %68 = arith.addf %65, %67 : vector<1x128xf32>
    %69 = vector.broadcast %68 : vector<1x128xf32> to vector<4x128xf32>
    %70 = arith.subf %49, %69 : vector<4x128xf32>
    %71 = arith.mulf %70, %70 : vector<4x128xf32>
    %72 = vector.broadcast %11 : vector<1x128xf32> to vector<4x128xf32>
    %73 = arith.mulf %71, %72 : vector<4x128xf32>
    %74 = vector.shape_cast %73 : vector<4x128xf32> to vector<1x4x128xf32>
    %cst_26 = arith.constant dense<0.000000e+00> : vector<1xf32>
    %75 = vector.multi_reduction <add>, %74, %cst_26 [1, 2] : vector<1x4x128xf32> to vector<1xf32>
    %76 = vector.shape_cast %75 : vector<1xf32> to vector<1x1x1xf32>
    %77 = vector.extract %76[0, 0, 0] : f32 from vector<1x1x1xf32>
    %cst_27 = arith.constant 3.906250e-03 : f32
    %78 = arith.mulf %77, %cst_27 : f32
    %79 = arith.mulf %70, %70 : vector<4x128xf32>
    %80 = vector.broadcast %13 : vector<1x128xf32> to vector<4x128xf32>
    %81 = arith.mulf %79, %80 : vector<4x128xf32>
    %82 = vector.shape_cast %81 : vector<4x128xf32> to vector<1x4x128xf32>
    %cst_28 = arith.constant dense<0.000000e+00> : vector<1xf32>
    %83 = vector.multi_reduction <add>, %82, %cst_28 [1, 2] : vector<1x4x128xf32> to vector<1xf32>
    %84 = vector.shape_cast %83 : vector<1xf32> to vector<1x1x1xf32>
    %85 = vector.extract %84[0, 0, 0] : f32 from vector<1x1x1xf32>
    %cst_29 = arith.constant 3.906250e-03 : f32
    %86 = arith.mulf %85, %cst_29 : f32
    %cst_30 = arith.constant 9.99999974E-6 : f32
    %87 = arith.addf %78, %cst_30 : f32
    %88 = math.rsqrt %87 : f32
    %89 = vector.broadcast %88 : f32 to vector<1x128xf32>
    %90 = arith.mulf %89, %11 : vector<1x128xf32>
    %cst_31 = arith.constant 9.99999974E-6 : f32
    %91 = arith.addf %86, %cst_31 : f32
    %92 = math.rsqrt %91 : f32
    %93 = vector.broadcast %92 : f32 to vector<1x128xf32>
    %94 = arith.mulf %93, %13 : vector<1x128xf32>
    %95 = arith.addf %90, %94 : vector<1x128xf32>
    %96 = vector.broadcast %95 : vector<1x128xf32> to vector<4x128xf32>
    %97 = arith.mulf %70, %96 : vector<4x128xf32>
    %98 = vector.broadcast %5 : vector<4x1xf32> to vector<4x128xf32>
    %99 = arith.mulf %97, %98 : vector<4x128xf32>
    %100 = vector.broadcast %6 : vector<4x1xf32> to vector<4x128xf32>
    %101 = arith.addf %99, %100 : vector<4x128xf32>
    %c0_32 = arith.constant 0 : index
    %c0_33 = arith.constant 0 : index
    %102 = vector.load %arg5[%c0_32, %c0_33] : memref<4x128xf32, #tpu.memory_space<vmem>>, vector<4x128xf32>
    tpu.vector_store %arg5[%c0_32, %c0_33], %101 {strides = array<i32>} : memref<4x128xf32, #tpu.memory_space<vmem>>, vector<4x128xf32>,
    return
  }
}

</mosaic_0001>

<bundles_post_ra>
// kernel: tpu_custom_call.1
= control target key start
LH: loop header
LB: loop body
LE: loop exit
PB: predicated region body
PF: predicated region fallthrough
CT: control target
= control target key end

     0   :  { %10 = vsyncpa [#allocation3], 0  ;;  %s2425_s0 = inlined_call_operand.hbm [shape: f32[4,128], index: 0, kind: input, shape index: {}]   ;;  %s2426_s1 = inlined_call_operand.hbm [shape: f32[4,384], index: 1, kind: input, shape index: {}]   ;;  %s2427_s2 = inlined_call_operand.hbm [shape: f32[4,128], index: 2, kind: input, shape index: {}]   ;;  %s2428_s3 = inlined_call_operand.hbm [shape: f32[4,3], index: 3, kind: input, shape index: {}]   ;;  %s2429_s4 = inlined_call_operand.hbm [shape: f32[2,128,128], index: 4, kind: input, shape index: {}]   ;;  %s2430_s5 = inlined_call_operand.hbm [shape: f32[4,128], index: 5, kind: output, shape index: {}]  }
   0x1   :  { %11 = vsyncpa [#allocation6], 0 }
   0x2   :  { %12 = vsyncpa [#allocation9], 0  ;;  %s30_s20 = sshll.u32 %s2426_s1, 4  ;;  %s31_s20 = int_to_ptr.hbm [resolvable:$true] %s30_s20 }
   0x3   :  { %13 = vsyncpa [#allocation4], 0  ;;  %s1755_s21 = smov [#allocation5]   ;;  %s52_s25 = sshll.u32 %s2428_s3, 4  ;;  %s53_s25 = int_to_ptr.hbm [resolvable:$true] %s52_s25 }
   0x4   :  { %s32_s22 = sshll.u32 %s1755_s21, 4  ;;  %s1756_s26 = smov [#allocation8]   ;;  %s33_s22 = int_to_ptr.vmem [resolvable:$true] %s32_s22 }
   0x5   :  { %35 = dma.hbm_to_vmem [thread:$0]  %s31_s20, 192, %s33_s22, [#allocation6]  }
   0x6   :  { %s54_s27 = sshll.u32 %s1756_s26, 4  ;;  %s19_s30 = sshll.u32 %s2425_s0, 4  ;;  %s55_s27 = int_to_ptr.vmem [resolvable:$true] %s54_s27  ;;  %s20_s30 = int_to_ptr.hbm [resolvable:$true] %s19_s30 }
   0x7   :  { %57 = dma.hbm_to_vmem [thread:$0]  %s53_s25, 64, %s55_s27, [#allocation9]  }
   0x8   :  { %s41_s7 = sshll.u32 %s2427_s2, 4  ;;  %s1757_s8 = smov [#allocation2]   ;;  %s42_s7 = int_to_ptr.hbm [resolvable:$true] %s41_s7 }
   0x9   :  { %s21_s9 = sshll.u32 %s1757_s8, 4  ;;  %s1758_s3 = smov [#allocation7]   ;;  %s22_s9 = int_to_ptr.vmem [resolvable:$true] %s21_s9 }
   0xa   :  { %24 = dma.hbm_to_vmem [thread:$0]  %s20_s30, 64, %s22_s9, [#allocation3]  }
   0xb   :  { %s43_s10 = sshll.u32 %s1758_s3, 4  ;;  %s62_s13 = sshll.u32 %s2429_s4, 4  ;;  %s44_s10 = int_to_ptr.vmem [resolvable:$true] %s43_s10  ;;  %s63_s13 = int_to_ptr.hbm [resolvable:$true] %s62_s13 }
   0xc   :  { %46 = dma.hbm_to_vmem [thread:$0]  %s42_s7, 64, %s44_s10, [#allocation6]  }
   0xd   :  { %s1759_s0 = smov [#allocation10]   ;;  %s1760_s15 = smov 128  }
   0xe   :  { %s64_s14 = sshll.u32 %s1759_s0, 4  ;;  %s1761_s16 = smov 8   ;;  %s65_s14 = int_to_ptr.vmem [resolvable:$true] %s64_s14 }
   0xf   :  { %70 = dma.hbm_to_vmem [thread:$0]  %s63_s13, 4096, %s65_s14, [#allocation9], %s1760_s15, %s1760_s15, %s1761_s16  }
  0x10   :  { %1747 = dma.done.wait [#allocation3], 64  }
  0x11   :  { %1748 = vsyncadd [#allocation3], 4294967232 }
  0x12   :  { %1749 = dma.done.wait [#allocation6], 256  }
  0x13   :  { %1750 = vsyncadd [#allocation6], 4294967040 }
  0x14   :  { %1751 = dma.done.wait [#allocation9], 4160  }
  0x15   :  { %1752 = vsyncadd [#allocation9], 4294963136  ;;  %v92_v0 = vld [vmem:[#allocation5] sm:$0xff]  ;;  %v91_v3 = vld [vmem:[#allocation2] sm:$0xf]  ;;  %vm382_vm0 = vcmask 1043456  }
  0x16   :  { %132 = vst [vmem:[#allocation1] ss:$2 sm:$0xff] %v92_v0  ;;  %1392 = vmatpush.msk.msra.mxu0 %vm382_vm0, %v91_v3  ;;  %1441 = vmatpush.msk.msra.mxu2 %vm382_vm0, %v91_v3  ;;  %vm237_vm1 = vcmask 31744   ;;  %v93_v4 = vld [vmem:[#allocation5 + $0x8] sm:$0xf]  ;;  %s1765_s27 = smov [#allocation11]  }
  0x17   :  { %134 = vst [vmem:[#allocation1 + $0x10] ss:$2 sm:$0xff] %v93_v4  ;;  %s1378_s28 = sshll.u32 %s1765_s27, 4  ;;  %s1380_s1 = sshll.u32 %s2430_s5, 4  ;;  %s1379_s28 = int_to_ptr.vmem [resolvable:$true] %s1378_s28  ;;  %s1381_s1 = int_to_ptr.hbm [resolvable:$true] %s1380_s1 }
  0x1d   :  { %v135_v1 = vld.sshfl [vmem:[#allocation1] sm:$0xff pattern:$0x75316420]  ;;  %v136_v2 = vld.sshfl [vmem:[#allocation1 + $0x8] sm:$0xff pattern:$0x75316420] }
  0x1e   :  { %141 = vxpose.xlu0.b32.start.end [1/1] (short) %v135_v1, 128  ;;  %v137_v6 = vld.sshfl [vmem:[#allocation1 + $0x10] sm:$0xff pattern:$0x75316420] }
  0x1f   :  { %205 = vxpose.xlu1.b32.start.end [1/1] (short) %v137_v6, 128 }
  0x9e   :  { %173 = vxpose.xlu0.b32.start.end [1/1] (short) %v136_v2, 128 }
  0xc2   :  { %v157_v5 = vpop.trf.xlu0 }
  0xc3   :  { %1393 = vmatmul.msk.f32.vlgmr.msra.gmra.mxu0 %vm237_vm1, %v157_v5  ;;  %v221_v44 = vpop.trf.xlu1 }
  0xca   :  { %v158_v7 = vpop.trf.xlu0 }
  0xcb   :  { %1394 = vmatmul.msk.f32.gmra.mxu0 %vm237_vm1, %v158_v7  ;;  %v222_v47 = vpop.trf.xlu1 }
  0xd2   :  { %v159_v8 = vpop.trf.xlu0 }
  0xd3   :  { %1395 = vmatmul.msk.f32.gmra.mxu0 %vm237_vm1, %v159_v8  ;;  %v223_v50 = vpop.trf.xlu1 }
  0xda   :  { %v160_v9 = vpop.trf.xlu0 }
  0xdb   :  { %1396 = vmatmul.msk.f32.gmra.mxu0 %vm237_vm1, %v160_v9  ;;  %v1867_v53 = vpop.trf.xlu1 }
  0xe2   :  { %v161_v10 = vpop.trf.xlu0 }
  0xe3   :  { %1397 = vmatmul.msk.f32.gmra.mxu0 %vm237_vm1, %v161_v10  ;;  %v1872_v57 = vpop.trf.xlu1 }
  0xea   :  { %v162_v11 = vpop.trf.xlu0 }
  0xeb   :  { %1398 = vmatmul.msk.f32.gmra.mxu0 %vm237_vm1, %v162_v11  ;;  %v1885_v9 = vpop.trf.xlu1 }
  0xf2   :  { %v163_v12 = vpop.trf.xlu0 }
  0xf3   :  { %1399 = vmatmul.msk.f32.gmra.mxu0 %vm237_vm1, %v163_v12 }
  0xfa   :  { %v164_v13 = vpop.trf.xlu0 }
  0xfb   :  { %1400 = vmatmul.msk.f32.gmra.mxu0 %vm237_vm1, %v164_v13 }
 0x102   :  { %v165_v14 = vpop.trf.xlu0 }
 0x103   :  { %1401 = vmatmul.msk.f32.gmra.mxu0 %vm237_vm1, %v165_v14 }
 0x10a   :  { %v166_v15 = vpop.trf.xlu0 }
 0x10b   :  { %1402 = vmatmul.msk.f32.gmra.mxu0 %vm237_vm1, %v166_v15  ;;  %v1891_v15 = vpop.trf.xlu1 }
 0x112   :  { %v167_v16 = vpop.trf.xlu0 }
 0x113   :  { %1403 = vmatmul.msk.f32.gmra.mxu0 %vm237_vm1, %v167_v16 }
 0x11a   :  { %v168_v17 = vpop.trf.xlu0 }
 0x11b   :  { %1404 = vmatmul.msk.f32.gmra.mxu0 %vm237_vm1, %v168_v17 }
 0x122   :  { %v169_v18 = vpop.trf.xlu0 }
 0x123   :  { %1405 = vmatmul.msk.f32.gmra.mxu0 %vm237_vm1, %v169_v18 }
 0x12a   :  { %v170_v19 = vpop.trf.xlu0 }
 0x12b   :  { %1406 = vmatmul.msk.f32.gmra.mxu0 %vm237_vm1, %v170_v19 }
 0x132   :  { %v171_v20 = vpop.trf.xlu0 }
 0x133   :  { %1407 = vmatmul.msk.f32.gmra.mxu0 %vm237_vm1, %v171_v20 }
 0x13a   :  { %v172_v21 = vpop.trf.xlu0 }
 0x13b   :  { %1408 = vmatmul.msk.f32.gmra.mxu0 %vm237_vm1, %v172_v21 }
 0x140   :  { %v1829_v22 = vpop.f32.mrf.mxu0 }
 0x142   :  { %v189_v23 = vpop.trf.xlu0 }
 0x143   :  { %1409 = vmatmul.msk.f32.gmra.mxu0 %vm237_vm1, %v189_v23 }
 0x148   :  { %v1832_v24 = vpop.f32.mrf.mxu0 }
 0x14a   :  { %v190_v25 = vpop.trf.xlu0 }
 0x14b   :  { %1410 = vmatmul.msk.f32.gmra.mxu0 %vm237_vm1, %v190_v25  ;;  %v1902_v25 = vpop.trf.xlu1 }
 0x150   :  { %v1835_v26 = vpop.f32.mrf.mxu0 }
 0x152   :  { %v191_v27 = vpop.trf.xlu0 }
 0x153   :  { %1411 = vmatmul.msk.f32.gmra.mxu0 %vm237_vm1, %v191_v27 }
 0x158   :  { %v1838_v28 = vpop.f32.mrf.mxu0 }
 0x15a   :  { %v192_v29 = vpop.trf.xlu0 }
 0x15b   :  { %1412 = vmatmul.msk.f32.gmra.mxu0 %vm237_vm1, %v192_v29 }
 0x160   :  { %v1841_v30 = vpop.f32.mrf.mxu0 }
 0x161   :  { %v547_v58 = vmax.f32 %v1829_v22, %v1841_v30 }
 0x162   :  { %v193_v31 = vpop.trf.xlu0 }
 0x163   :  { %1413 = vmatmul.msk.f32.gmra.mxu0 %vm237_vm1, %v193_v31 }
 0x168   :  { %v1844_v32 = vpop.f32.mrf.mxu0 }
 0x169   :  { %v548_v56 = vmax.f32 %v1832_v24, %v1844_v32 }
 0x16a   :  { %v194_v33 = vpop.trf.xlu0 }
 0x16b   :  { %1414 = vmatmul.msk.f32.gmra.mxu0 %vm237_vm1, %v194_v33 }
 0x170   :  { %v1847_v34 = vpop.f32.mrf.mxu0 }
 0x171   :  { %v549_v59 = vmax.f32 %v1835_v26, %v1847_v34 }
 0x172   :  { %v195_v35 = vpop.trf.xlu0 }
 0x173   :  { %1415 = vmatmul.msk.f32.gmra.mxu0 %vm237_vm1, %v195_v35 }
 0x178   :  { %v1850_v36 = vpop.f32.mrf.mxu0 }
 0x179   :  { %v550_v60 = vmax.f32 %v1838_v28, %v1850_v36 }
 0x17a   :  { %v196_v37 = vpop.trf.xlu0 }
 0x17b   :  { %1416 = vmatmul.msk.f32.gmra.mxu0 %vm237_vm1, %v196_v37 }
 0x180   :  { %v1853_v38 = vpop.f32.mrf.mxu0 }
 0x181   :  { %v551_v62 = vmax.f32 %v547_v58, %v1853_v38 }
 0x182   :  { %v197_v39 = vpop.trf.xlu0 }
 0x183   :  { %1417 = vmatmul.msk.f32.gmra.mxu0 %vm237_vm1, %v197_v39 }
 0x188   :  { %v1856_v40 = vpop.f32.mrf.mxu0 }
 0x189   :  { %v552_v61 = vmax.f32 %v548_v56, %v1856_v40 }
 0x18a   :  { %v198_v41 = vpop.trf.xlu0 }
 0x18b   :  { %1418 = vmatmul.msk.f32.gmra.mxu0 %vm237_vm1, %v198_v41 }
 0x190   :  { %v1859_v42 = vpop.f32.mrf.mxu0 }
 0x191   :  { %v553_v63 = vmax.f32 %v549_v59, %v1859_v42 }
 0x192   :  { %v199_v43 = vpop.trf.xlu0 }
 0x193   :  { %1419 = vmatmul.msk.f32.gmra.mxu0 %vm237_vm1, %v199_v43 }
 0x198   :  { %v1862_v45 = vpop.f32.mrf.mxu0 }
 0x199   :  { %v554_v0 = vmax.f32 %v550_v60, %v1862_v45 }
 0x19a   :  { %v200_v46 = vpop.trf.xlu0 }
 0x19b   :  { %1420 = vmatmul.msk.f32.gmra.mxu0 %vm237_vm1, %v200_v46  ;;  %v229_v46 = vpop.trf.xlu1 }
 0x19c   :  { %1433 = vmatmul.msk.f32.vlgmr.msra.gmra.mxu2 %vm237_vm1, %v229_v46  ;;  %v122_v46 = vld [vmem:[#allocation10 + $0xc8] sm:$0xff] }
 0x1a0   :  { %v439_v48 = vpop.f32.mrf.mxu0 }
 0x1a1   :  { %v555_v3 = vmax.f32 %v551_v62, %v439_v48 }
 0x1a2   :  { %v201_v49 = vpop.trf.xlu0 }
 0x1a3   :  { %1421 = vmatmul.msk.f32.gmra.mxu0 %vm237_vm1, %v201_v49  ;;  %v230_v56 = vpop.trf.xlu1 }
 0x1a4   :  { %1434 = vmatmul.msk.f32.gmra.mxu2 %vm237_vm1, %v230_v56  ;;  %v2041_v56 = vld [vmem:[#allocation10 + $0x28] sm:$0xff] }
 0x1a5   :  { %2473 = vst [vmem:[#allocation21_spill] sm:$0xff] %v2041_v56 }
 0x1a8   :  { %v442_v51 = vpop.f32.mrf.mxu0 }
 0x1a9   :  { %v556_v1 = vmax.f32 %v552_v61, %v442_v51 }
 0x1aa   :  { %v202_v52 = vpop.trf.xlu0 }
 0x1ab   :  { %1422 = vmatmul.msk.f32.gmra.mxu0 %vm237_vm1, %v202_v52  ;;  %v559_v7 = vmax.f32 %v555_v3, %v556_v1 }
 0x1b0   :  { %v445_v54 = vpop.f32.mrf.mxu0 }
 0x1b1   :  { %v557_v4 = vmax.f32 %v553_v63, %v445_v54 }
 0x1b2   :  { %v203_v55 = vpop.trf.xlu0 }
 0x1b3   :  { %1423 = vmatmul.msk.f32.gmra.mxu0 %vm237_vm1, %v203_v55 }
 0x1b8   :  { %v448_v2 = vpop.f32.mrf.mxu0 }
 0x1b9   :  { %v558_v5 = vmax.f32 %v554_v0, %v448_v2 }
 0x1ba   :  { %v204_v6 = vpop.trf.xlu0 }
 0x1bb   :  { %v560_v8 = vmax.f32 %v557_v4, %v558_v5  ;;  %1424 = vmatmul.msk.f32.gmra.mxu0 %vm237_vm1, %v204_v6 }
 0x1bd   :  { %v561_v10 = vmax.f32 %v559_v7, %v560_v8 }
 0x1bf   :  { %v562_v11 = vrot.slane %v561_v10, 4 }
 0x1c0   :  { %v1887_v12 = vpop.f32.mrf.mxu0 }
 0x1c1   :  { %v563_v13 = vmax.f32 %v561_v10, %v562_v11  ;;  %713 = vmax.xlane.f32.xlu1 %v1887_v12 }
 0x1c3   :  { %v564_v14 = vrot.slane %v563_v13, 2  ;;  %1425 = vmatmul.msk.f32.gmra.mxu0 %vm237_vm1, %v221_v44 }
 0x1c5   :  { %v565_v16 = vmax.f32 %v563_v13, %v564_v14 }
 0x1c7   :  { %v566_v17 = vrot.slane %v565_v16, 1 }
 0x1c8   :  { %v1893_v18 = vpop.f32.mrf.mxu0 }
 0x1c9   :  { %v1895_v19 = vmax.f32 %v565_v16, %v566_v17  ;;  %715 = vmax.xlane.f32.xlu2 %v1893_v18 }
 0x1cb   :  { %v583_v20 = vsub.f32 %v448_v2, %v1895_v19  ;;  %1426 = vmatmul.msk.f32.gmra.mxu0 %vm237_vm1, %v222_v47  ;;  %v582_v21 = vsub.f32 %v445_v54, %v1895_v19  ;;  %v581_v23 = vsub.f32 %v442_v51, %v1895_v19  ;;  %v580_v31 = vsub.f32 %v439_v48, %v1895_v19  ;;  %v231_v2 = vpop.trf.xlu1 }
 0x1cc   :  { %v579_v35 = vsub.f32 %v1862_v45, %v1895_v19  ;;  %v578_v41 = vsub.f32 %v1859_v42, %v1895_v19  ;;  %v577_v44 = vsub.f32 %v1856_v40, %v1895_v19  ;;  %v576_v48 = vsub.f32 %v1853_v38, %v1895_v19  ;;  %1435 = vmatmul.msk.f32.gmra.mxu2 %vm237_vm1, %v231_v2 }
 0x1cd   :  { %v614_v27 = vmul.f32 1.442695, %v583_v20  ;;  %v612_v29 = vmul.f32 1.442695, %v582_v21  ;;  %v610_v33 = vmul.f32 1.442695, %v581_v23  ;;  %v574_v52 = vsub.f32 %v1847_v34, %v1895_v19 }
 0x1ce   :  { %v608_v39 = vmul.f32 1.442695, %v580_v31  ;;  %v606_v43 = vmul.f32 1.442695, %v579_v35  ;;  %v604_v45 = vmul.f32 1.442695, %v578_v41  ;;  %v573_v55 = vsub.f32 %v1844_v32, %v1895_v19 }
 0x1cf   :  { %1470 = vpow2.f32 %v614_v27  ;;  %v602_v49 = vmul.f32 1.442695, %v577_v44  ;;  %v600_v38 = vmul.f32 1.442695, %v576_v48  ;;  %v596_v59 = vmul.f32 1.442695, %v574_v52 }
 0x1d0   :  { %v1907_v37 = vpop.f32.mrf.mxu0  ;;  %1472 = vpow2.f32 %v612_v29  ;;  %v572_v34 = vsub.f32 %v1841_v30, %v1895_v19  ;;  %v594_v60 = vmul.f32 1.442695, %v573_v55  ;;  %v571_v32 = vsub.f32 %v1838_v28, %v1895_v19  ;;  %v2012_v20 = vld [vmem:[#allocation10 + $0x8] sm:$0xff]  ;;  %v128_v23 = vld [vmem:[#allocation10 + $0xf8] sm:$0xff]  ;;  %v127_v27 = vld [vmem:[#allocation10 + $0xf0] sm:$0xff] }
 0x1d1   :  { %717 = vmax.xlane.f32.xlu2 %v1907_v37  ;;  %1474 = vpow2.f32 %v610_v33  ;;  %v570_v63 = vsub.f32 %v1835_v26, %v1895_v19  ;;  %v569_v1 = vsub.f32 %v1832_v24, %v1895_v19  ;;  %v568_v26 = vsub.f32 %v1829_v22, %v1895_v19  ;;  %2469 = vst [vmem:[#allocation17_spill] sm:$0xff] %v2012_v20  ;;  %v2021_v29 = vld [vmem:[#allocation10 + $0x10] sm:$0xff]  ;;  %v125_v33 = vld [vmem:[#allocation10 + $0xe0] sm:$0xff] }
 0x1d2   :  { %1476 = vpow2.f32 %v608_v39  ;;  %v592_v30 = vmul.f32 1.442695, %v572_v34  ;;  %v590_v28 = vmul.f32 1.442695, %v571_v32  ;;  %793 = vmatpush.msrb.mxu2 %v128_v23  ;;  %2470 = vst [vmem:[#allocation18_spill] sm:$0xff] %v2021_v29  ;;  %v124_v39 = vld [vmem:[#allocation10 + $0xd8] sm:$0xff] }
 0x1d3   :  { %1427 = vmatmul.msk.f32.gmra.mxu0 %vm237_vm1, %v223_v50  ;;  %1478 = vpow2.f32 %v606_v43  ;;  %v575_v50 = vsub.f32 %v1850_v36, %v1895_v19  ;;  %v588_v4 = vmul.f32 1.442695, %v570_v63  ;;  %v586_v5 = vmul.f32 1.442695, %v569_v1  ;;  %v232_v8 = vpop.trf.xlu1  ;;  %v123_v41 = vld [vmem:[#allocation10 + $0xd0] sm:$0xff]  ;;  %v2028_v43 = vld [vmem:[#allocation10 + $0x18] sm:$0xff] }
 0x1d4   :  { %1480 = vpow2.f32 %v604_v45  ;;  %v584_v7 = vmul.f32 1.442695, %v568_v26  ;;  %1436 = vmatmul.msk.f32.gmra.mxu2 %vm237_vm1, %v232_v8  ;;  %2471 = vst [vmem:[#allocation19_spill] sm:$0xff] %v2028_v43  ;;  %v121_v45 = vld [vmem:[#allocation10 + $0xc0] sm:$0xff]  ;;  %v115_v34 = vld [vmem:[#allocation10 + $0x90] sm:$0xff]  ;;  %v114_v32 = vld [vmem:[#allocation10 + $0x88] sm:$0xff] }
 0x1d5   :  { %v1915_v47 = vpop.eup %1470  ;;  %1482 = vpow2.f32 %v602_v49  ;;  %v598_v36 = vmul.f32 1.442695, %v575_v50  ;;  %794 = vmatpush.msrb.mxu2 %v127_v27  ;;  %v120_v49 = vld [vmem:[#allocation10 + $0xb8] sm:$0xff]  ;;  %v119_v50 = vld [vmem:[#allocation10 + $0xb0] sm:$0xff]  ;;  %v117_v55 = vld [vmem:[#allocation10 + $0xa0] sm:$0xff] }
 0x1d6   :  { %616 = vmatpush.msra.mxu1 %v1915_v47  ;;  %v1921_v42 = vpop.eup %1472  ;;  %1484 = vpow2.f32 %v600_v38  ;;  %v2035_v38 = vld [vmem:[#allocation10 + $0x20] sm:$0xff]  ;;  %v2049_v63 = vld [vmem:[#allocation10 + $0x30] sm:$0xff]  ;;  %v2056_v1 = vld [vmem:[#allocation10 + $0x38] sm:$0xff] }
 0x1d7   :  { %v1928_v51 = vpop.eup %1474  ;;  %1486 = vpow2.f32 %v598_v36  ;;  %2472 = vst [vmem:[#allocation20_spill] sm:$0xff] %v2035_v38  ;;  %v118_v36 = vld [vmem:[#allocation10 + $0xa8] sm:$0xff] }
 0x1d8   :  { %v1925_v40 = vpop.f32.mrf.mxu0  ;;  %617 = vmatpush.msra.mxu1 %v1921_v42  ;;  %v1934_v54 = vpop.eup %1476  ;;  %1488 = vpow2.f32 %v596_v59  ;;  %v116_v59 = vld [vmem:[#allocation10 + $0x98] sm:$0xff]  ;;  %2474 = vst [vmem:[#allocation22_spill] sm:$0xff] %v2049_v63 }
 0x1d9   :  { %719 = vmax.xlane.f32.xlu2 %v1925_v40  ;;  %v1941_v58 = vpop.eup %1478  ;;  %1490 = vpow2.f32 %v594_v60  ;;  %2475 = vst [vmem:[#allocation23_spill] sm:$0xff] %v2056_v1 }
 0x1da   :  { %618 = vmatpush.msra.mxu1 %v1928_v51  ;;  %1492 = vpow2.f32 %v592_v30  ;;  %v2047_v30 = vld [vmem:[#allocation10 + $0x80] sm:$0xff] }
 0x1db   :  { %1428 = vmatmul.msk.f32.gmra.mxu0 %vm237_vm1, %v1867_v53  ;;  %v1947_v53 = vpop.eup %1480  ;;  %1494 = vpow2.f32 %v590_v28  ;;  %v233_v17 = vpop.trf.xlu1 }
 0x1dc   :  { %619 = vmatpush.msra.mxu1 %v1934_v54  ;;  %v1954_v62 = vpop.eup %1482  ;;  %1496 = vpow2.f32 %v588_v4  ;;  %1437 = vmatmul.msk.f32.gmra.mxu2 %vm237_vm1, %v233_v17  ;;  %v2062_v4 = vld [vmem:[#allocation10 + $0x40] sm:$0xff]  ;;  %v2069_v17 = vld [vmem:[#allocation10 + $0x48] sm:$0xff] }
 0x1dd   :  { %v1960_v0 = vpop.eup %1484  ;;  %1498 = vpow2.f32 %v586_v5  ;;  %2476 = vst [vmem:[#allocation24_spill] sm:$0xff] %v2062_v4 }
 0x1de   :  { %620 = vmatpush.msra.mxu1 %v1941_v58  ;;  %v1967_v3 = vpop.eup %1486  ;;  %1500 = vpow2.f32 %v584_v7  ;;  %2477 = vst [vmem:[#allocation25_spill] sm:$0xff] %v2069_v17 }
 0x1e0   :  { %v1951_v61 = vpop.f32.mrf.mxu0  ;;  %621 = vmatpush.msra.mxu1 %v1947_v53 }
 0x1e1   :  { %721 = vmax.xlane.f32.xlu2 %v1951_v61 }
 0x1e2   :  { %622 = vmatpush.msra.mxu1 %v1954_v62 }
 0x1e3   :  { %1429 = vmatmul.msk.f32.gmra.mxu0 %vm237_vm1, %v1872_v57  ;;  %v1973_v57 = vpop.eup %1488  ;;  %v234_v21 = vpop.trf.xlu1 }
 0x1e4   :  { %623 = vmatpush.msra.mxu1 %v1960_v0  ;;  %v1978_v24 = vpop.eup %1490  ;;  %1438 = vmatmul.msk.f32.gmra.mxu2 %vm237_vm1, %v234_v21 }
 0x1e5   :  { %v1982_v22 = vpop.eup %1492 }
 0x1e6   :  { %624 = vmatpush.msra.mxu1 %v1967_v3  ;;  %v1987_v10 = vpop.eup %1494 }
 0x1e7   :  { %v1991_v11 = vpop.eup %1496 }
 0x1e8   :  { %v1975_v6 = vpop.f32.mrf.mxu0  ;;  %625 = vmatpush.msra.mxu1 %v1973_v57  ;;  %v1996_v14 = vpop.eup %1498 }
 0x1e9   :  { %723 = vmax.xlane.f32.xlu2 %v1975_v6  ;;  %v2002_v16 = vpop.eup %1500 }
 0x1ea   :  { %626 = vmatpush.msra.mxu1 %v1978_v24 }
 0x1eb   :  { %1430 = vmatmul.msk.f32.gmra.mxu0 %vm237_vm1, %v1885_v9  ;;  %v2000_v9 = vld [vmem:[#allocation10] sm:$0xff]  ;;  %v235_v31 = vpop.trf.xlu1 }
 0x1ec   :  { %627 = vmatpush.msra.mxu1 %v1982_v22  ;;  %2468 = vst [vmem:[#allocation16_spill] sm:$0xff] %v2000_v9  ;;  %1439 = vmatmul.msk.f32.gmra.mxu2 %vm237_vm1, %v235_v31 }
 0x1ee   :  { %628 = vmatpush.msra.mxu1 %v1987_v10 }
 0x1f0   :  { %v1993_v13 = vpop.f32.mrf.mxu0  ;;  %629 = vmatpush.msra.mxu1 %v1991_v11 }
 0x1f1   :  { %725 = vmax.xlane.f32.xlu2 %v1993_v13 }
 0x1f2   :  { %630 = vmatpush.msra.mxu1 %v1996_v14 }
 0x1f3   :  { %1431 = vmatmul.msk.f32.gmra.mxu0 %vm237_vm1, %v1891_v15  ;;  %v236_v44 = vpop.trf.xlu1 }
 0x1f4   :  { %631 = vmatpush.msra.mxu1 %v2002_v16  ;;  %1440 = vmatmul.msk.f32.gmra.mxu2 %vm237_vm1, %v236_v44 }
 0x1f5   :  { %632 = vmatmul.f32.vlgmr.msra.gmra.mxu1 %v2000_v9 }
 0x1f8   :  { %v2009_v19 = vpop.f32.mrf.mxu0 }
 0x1f9   :  { %727 = vmax.xlane.f32.xlu2 %v2009_v19 }
 0x1fb   :  { %1432 = vmatmul.msk.f32.gmra.mxu0 %vm237_vm1, %v1902_v25  ;;  %v126_v25 = vld [vmem:[#allocation10 + $0xe8] sm:$0xff] }
 0x1fc   :  { %795 = vmatpush.msrb.mxu2 %v126_v25 }
 0x1fd   :  { %635 = vmatmul.f32.gmra.mxu1 %v2012_v20 }
 0x1fe   :  { %796 = vmatpush.msrb.mxu2 %v125_v33 }
 0x200   :  { %v2018_v15 = vpop.f32.mrf.mxu0  ;;  %797 = vmatpush.msrb.mxu2 %v124_v39 }
 0x201   :  { %729 = vmax.xlane.f32.xlu2 %v2018_v15 }
 0x202   :  { %798 = vmatpush.msrb.mxu2 %v123_v41 }
 0x204   :  { %799 = vmatpush.msrb.mxu2 %v122_v46 }
 0x205   :  { %638 = vmatmul.f32.gmra.mxu1 %v2021_v29 }
 0x206   :  { %800 = vmatpush.msrb.mxu2 %v121_v45 }
 0x208   :  { %v2025_v35 = vpop.f32.mrf.mxu0  ;;  %801 = vmatpush.msrb.mxu2 %v120_v49 }
 0x209   :  { %731 = vmax.xlane.f32.xlu2 %v2025_v35 }
 0x20a   :  { %802 = vmatpush.msrb.mxu2 %v119_v50 }
 0x20c   :  { %803 = vmatpush.msrb.mxu2 %v118_v36 }
 0x20d   :  { %641 = vmatmul.f32.gmra.mxu1 %v2028_v43 }
 0x20e   :  { %804 = vmatpush.msrb.mxu2 %v117_v55 }
 0x210   :  { %v2032_v48 = vpop.f32.mrf.mxu0  ;;  %805 = vmatpush.msrb.mxu2 %v116_v59 }
 0x211   :  { %733 = vmax.xlane.f32.xlu2 %v2032_v48 }
 0x212   :  { %806 = vmatpush.msrb.mxu2 %v115_v34 }
 0x214   :  { %807 = vmatpush.msrb.mxu2 %v114_v32 }
 0x215   :  { %644 = vmatmul.f32.gmra.mxu1 %v2035_v38 }
 0x216   :  { %808 = vmatpush.msrb.mxu2 %v2047_v30 }
 0x218   :  { %v2038_v52 = vpop.f32.mrf.mxu0 }
 0x219   :  { %735 = vmax.xlane.f32.xlu2 %v2038_v52 }
 0x21d   :  { %647 = vmatmul.f32.gmra.mxu1 %v2041_v56 }
 0x220   :  { %v2044_v60 = vpop.f32.mrf.mxu0 }
 0x221   :  { %737 = vmax.xlane.f32.xlu2 %v2044_v60 }
 0x225   :  { %650 = vmatmul.f32.gmra.mxu1 %v2049_v63 }
 0x228   :  { %v2053_v28 = vpop.f32.mrf.mxu0 }
 0x229   :  { %739 = vmax.xlane.f32.xlu2 %v2053_v28 }
 0x22d   :  { %653 = vmatmul.f32.gmra.mxu1 %v2056_v1 }
 0x230   :  { %v2059_v2 = vpop.f32.mrf.mxu0 }
 0x231   :  { %741 = vmax.xlane.f32.xlu2 %v2059_v2 }
 0x234   :  { %v714_v26 = vpop.xlane.xlu1 %713 }
 0x235   :  { %v745_v5 = vsub.f32 %v1887_v12, %v714_v26  ;;  %656 = vmatmul.f32.gmra.mxu1 %v2062_v4  ;;  %v2076_v12 = vld [vmem:[#allocation10 + $0x50] sm:$0xff] }
 0x236   :  { %2478 = vst [vmem:[#allocation26_spill] sm:$0xff] %v2076_v12 }
 0x237   :  { %v761_v7 = vmul.f32 1.442695, %v745_v5 }
 0x238   :  { %v2066_v8 = vpop.f32.mrf.mxu0 }
 0x239   :  { %1502 = vpow2.f32 %v761_v7  ;;  %743 = vmax.xlane.f32.xlu2 %v2066_v8 }
 0x23c   :  { %v716_v21 = vpop.xlane.xlu2 %715 }
 0x23d   :  { %v746_v23 = vsub.f32 %v1893_v18, %v716_v21  ;;  %659 = vmatmul.f32.gmra.mxu1 %v2069_v17  ;;  %v2083_v18 = vld [vmem:[#allocation10 + $0x58] sm:$0xff] }
 0x23e   :  { %2479 = vst [vmem:[#allocation27_spill] sm:$0xff] %v2083_v18 }
 0x23f   :  { %v2073_v27 = vpop.eup %1502  ;;  %v763_v31 = vmul.f32 1.442695, %v746_v23 }
 0x240   :  { %809 = vmatmul.f32.vlgmr.msrb.gmra.mxu2 %v2073_v27 }
 0x241   :  { %1504 = vpow2.f32 %v763_v31 }
 0x244   :  { %v718_v25 = vpop.xlane.xlu2 %717 }
 0x245   :  { %v747_v33 = vsub.f32 %v1907_v37, %v718_v25  ;;  %662 = vmatmul.f32.gmra.mxu1 %v2076_v12  ;;  %v2090_v37 = vld [vmem:[#allocation10 + $0x60] sm:$0xff] }
 0x246   :  { %2480 = vst [vmem:[#allocation28_spill] sm:$0xff] %v2090_v37 }
 0x247   :  { %v2080_v39 = vpop.eup %1504  ;;  %v765_v41 = vmul.f32 1.442695, %v747_v33 }
 0x248   :  { %812 = vmatmul.f32.gmra.mxu2 %v2080_v39 }
 0x249   :  { %1506 = vpow2.f32 %v765_v41 }
 0x24c   :  { %v720_v44 = vpop.xlane.xlu2 %719 }
 0x24d   :  { %v748_v46 = vsub.f32 %v1925_v40, %v720_v44  ;;  %665 = vmatmul.f32.gmra.mxu1 %v2083_v18  ;;  %v2097_v40 = vld [vmem:[#allocation10 + $0x68] sm:$0xff] }
 0x24e   :  { %2481 = vst [vmem:[#allocation29_spill] sm:$0xff] %v2097_v40 }
 0x24f   :  { %v2087_v45 = vpop.eup %1506  ;;  %v767_v49 = vmul.f32 1.442695, %v748_v46 }
 0x250   :  { %815 = vmatmul.f32.gmra.mxu2 %v2087_v45 }
 0x251   :  { %1508 = vpow2.f32 %v767_v49 }
 0x254   :  { %v722_v50 = vpop.xlane.xlu2 %721 }
 0x255   :  { %v749_v36 = vsub.f32 %v1951_v61, %v722_v50  ;;  %668 = vmatmul.f32.gmra.mxu1 %v2090_v37  ;;  %v2104_v61 = vld [vmem:[#allocation10 + $0x70] sm:$0xff]  ;;  %v2121_v50 = vpop.f32.mrf.mxu2 }
 0x256   :  { %2482 = vst [vmem:[#allocation30_spill] sm:$0xff] %v2104_v61 }
 0x257   :  { %v2094_v55 = vpop.eup %1508  ;;  %v769_v59 = vmul.f32 1.442695, %v749_v36 }
 0x258   :  { %818 = vmatmul.f32.gmra.mxu2 %v2094_v55 }
 0x259   :  { %1510 = vpow2.f32 %v769_v59 }
 0x25c   :  { %v724_v34 = vpop.xlane.xlu2 %723 }
 0x25d   :  { %v750_v32 = vsub.f32 %v1975_v6, %v724_v34  ;;  %671 = vmatmul.f32.gmra.mxu1 %v2097_v40  ;;  %v2111_v6 = vld [vmem:[#allocation10 + $0x78] sm:$0xff] }
 0x25e   :  { %2483 = vst [vmem:[#allocation31_spill] sm:$0xff] %v2111_v6 }
 0x25f   :  { %v2101_v26 = vpop.eup %1510  ;;  %v771_v5 = vmul.f32 1.442695, %v750_v32 }
 0x260   :  { %821 = vmatmul.f32.gmra.mxu2 %v2101_v26 }
 0x261   :  { %1512 = vpow2.f32 %v771_v5 }
 0x264   :  { %v726_v7 = vpop.xlane.xlu2 %725 }
 0x265   :  { %v751_v21 = vsub.f32 %v1993_v13, %v726_v7  ;;  %674 = vmatmul.f32.gmra.mxu1 %v2104_v61 }
 0x267   :  { %v2108_v23 = vpop.eup %1512  ;;  %v773_v31 = vmul.f32 1.442695, %v751_v21  ;;  %v2131_v21 = vpop.f32.mrf.mxu2 }
 0x268   :  { %824 = vmatmul.f32.gmra.mxu2 %v2108_v23 }
 0x269   :  { %1514 = vpow2.f32 %v773_v31 }
 0x26c   :  { %v728_v25 = vpop.xlane.xlu2 %727 }
 0x26d   :  { %v752_v33 = vsub.f32 %v2009_v19, %v728_v25  ;;  %677 = vmatmul.f32.gmra.mxu1 %v2111_v6 }
 0x26f   :  { %v2115_v41 = vpop.eup %1514  ;;  %v775_v44 = vmul.f32 1.442695, %v752_v33 }
 0x270   :  { %827 = vmatmul.f32.gmra.mxu2 %v2115_v41 }
 0x271   :  { %1516 = vpow2.f32 %v775_v44 }
 0x272   :  { %v2118_v13 = vpop.f32.mrf.mxu1 }
 0x274   :  { %v730_v46 = vpop.xlane.xlu2 %729 }
 0x275   :  { %v753_v49 = vsub.f32 %v2018_v15, %v730_v46 }
 0x277   :  { %v2123_v36 = vpop.eup %1516  ;;  %v777_v59 = vmul.f32 1.442695, %v753_v49 }
 0x278   :  { %830 = vmatmul.f32.gmra.mxu2 %v2123_v36 }
 0x279   :  { %1518 = vpow2.f32 %v777_v59 }
 0x27a   :  { %v2126_v19 = vpop.f32.mrf.mxu1 }
 0x27c   :  { %v732_v34 = vpop.xlane.xlu2 %731 }
 0x27d   :  { %v754_v32 = vsub.f32 %v2025_v35, %v732_v34  ;;  %v2140_v35 = vpop.f32.mrf.mxu2 }
 0x27f   :  { %v2129_v5 = vpop.eup %1518  ;;  %v779_v7 = vmul.f32 1.442695, %v754_v32 }
 0x280   :  { %833 = vmatmul.f32.gmra.mxu2 %v2129_v5 }
 0x281   :  { %1520 = vpow2.f32 %v779_v7 }
 0x282   :  { %v2134_v15 = vpop.f32.mrf.mxu1 }
 0x284   :  { %v734_v31 = vpop.xlane.xlu2 %733 }
 0x285   :  { %v755_v25 = vsub.f32 %v2032_v48, %v734_v31  ;;  %v2150_v7 = vpop.f32.mrf.mxu2 }
 0x286   :  { %2484 = vst [vmem:[#allocation32_spill] sm:$0xff] %v2150_v7  ;;  %v2195_v7 = vperm.slane %v2047_v30, 0 }
 0x287   :  { %v2137_v33 = vpop.eup %1520  ;;  %v781_v44 = vmul.f32 1.442695, %v755_v25 }
 0x288   :  { %836 = vmatmul.f32.gmra.mxu2 %v2137_v33 }
 0x289   :  { %1522 = vpow2.f32 %v781_v44 }
 0x28a   :  { %v2142_v46 = vpop.f32.mrf.mxu1 }
 0x28c   :  { %v736_v49 = vpop.xlane.xlu2 %735 }
 0x28d   :  { %v756_v59 = vsub.f32 %v2038_v52, %v736_v49 }
 0x28f   :  { %v2145_v34 = vpop.eup %1522  ;;  %v783_v32 = vmul.f32 1.442695, %v756_v59  ;;  %v2158_v59 = vpop.f32.mrf.mxu2 }
 0x290   :  { %839 = vmatmul.f32.gmra.mxu2 %v2145_v34  ;;  %2485 = vst [vmem:[#allocation33_spill] sm:$0xff] %v2158_v59 }
 0x291   :  { %1524 = vpow2.f32 %v783_v32 }
 0x292   :  { %v2148_v48 = vpop.f32.mrf.mxu1 }
 0x294   :  { %v738_v31 = vpop.xlane.xlu2 %737 }
 0x295   :  { %v757_v25 = vsub.f32 %v2044_v60, %v738_v31 }
 0x297   :  { %v2153_v44 = vpop.eup %1524  ;;  %v785_v6 = vmul.f32 1.442695, %v757_v25 }
 0x298   :  { %842 = vmatmul.f32.gmra.mxu2 %v2153_v44 }
 0x299   :  { %1526 = vpow2.f32 %v785_v6  ;;  %v2167_v6 = vpop.f32.mrf.mxu2 }
 0x29a   :  { %v2156_v52 = vpop.f32.mrf.mxu1  ;;  %2486 = vst [vmem:[#allocation34_spill] sm:$0xff] %v2167_v6 }
 0x29c   :  { %v740_v49 = vpop.xlane.xlu2 %739 }
 0x29d   :  { %v758_v32 = vsub.f32 %v2053_v28, %v740_v49 }
 0x29f   :  { %v2161_v61 = vpop.eup %1526  ;;  %v787_v40 = vmul.f32 1.442695, %v758_v32 }
 0x2a0   :  { %845 = vmatmul.f32.gmra.mxu2 %v2161_v61 }
 0x2a1   :  { %1528 = vpow2.f32 %v787_v40  ;;  %v2174_v40 = vpop.f32.mrf.mxu2 }
 0x2a2   :  { %v651_v60 = vpop.f32.mrf.mxu1  ;;  %2487 = vst [vmem:[#allocation35_spill] sm:$0xff] %v2174_v40 }
 0x2a4   :  { %v742_v31 = vpop.xlane.xlu2 %741 }
 0x2a5   :  { %v759_v25 = vsub.f32 %v2059_v2, %v742_v31 }
 0x2a7   :  { %v2165_v37 = vpop.eup %1528  ;;  %v789_v18 = vmul.f32 1.442695, %v759_v25 }
 0x2a8   :  { %848 = vmatmul.f32.gmra.mxu2 %v2165_v37 }
 0x2a9   :  { %1530 = vpow2.f32 %v789_v18  ;;  %v2179_v4 = vpop.f32.mrf.mxu2 }
 0x2aa   :  { %v654_v12 = vpop.f32.mrf.mxu1  ;;  %2488 = vst [vmem:[#allocation36_spill] sm:$0xff] %v2179_v4 }
 0x2ac   :  { %v744_v28 = vpop.xlane.xlu2 %743 }
 0x2ad   :  { %v760_v49 = vsub.f32 %v2066_v8, %v744_v28 }
 0x2af   :  { %v2171_v32 = vpop.eup %1530  ;;  %v791_v17 = vmul.f32 1.442695, %v760_v49 }
 0x2b0   :  { %851 = vmatmul.f32.gmra.mxu2 %v2171_v32 }
 0x2b1   :  { %1532 = vpow2.f32 %v791_v17 }
 0x2b2   :  { %v657_v2 = vpop.f32.mrf.mxu1 }
 0x2b7   :  { %v2176_v31 = vpop.eup %1532 }
 0x2b8   :  { %854 = vmatmul.f32.gmra.mxu2 %v2176_v31 }
 0x2ba   :  { %v660_v25 = vpop.f32.mrf.mxu1 }
 0x2c2   :  { %v663_v18 = vpop.f32.mrf.mxu1 }
 0x2c3   :  { %v2181_v1 = vpop.f32.mrf.mxu2 }
 0x2ca   :  { %v666_v8 = vpop.f32.mrf.mxu1 }
 0x2cb   :  { %v2183_v28 = vpop.f32.mrf.mxu2 }
 0x2d2   :  { %v669_v49 = vpop.f32.mrf.mxu1 }
 0x2d3   :  { %v2185_v63 = vpop.f32.mrf.mxu2 }
 0x2da   :  { %v672_v56 = vpop.f32.mrf.mxu1 }
 0x2db   :  { %v2187_v38 = vpop.f32.mrf.mxu2 }
 0x2e2   :  { %v675_v17 = vpop.f32.mrf.mxu1 }
 0x2e3   :  { %v2189_v43 = vpop.f32.mrf.mxu2  ;;  %1534 = vrcp.f32 %v675_v17 }
 0x2e4   :  { %1536 = vrcp.f32 %v672_v56 }
 0x2e5   :  { %1538 = vrcp.f32 %v669_v49 }
 0x2e9   :  { %v1535_v9 = vpop.eup %1534 }
 0x2ea   :  { %v678_v29 = vpop.f32.mrf.mxu1  ;;  %v1537_v4 = vpop.eup %1536  ;;  %v711_v6 = vmul.f32 %v1535_v9, %v1921_v42 }
 0x2eb   :  { %1540 = vrcp.f32 %v678_v29  ;;  %v2191_v20 = vpop.f32.mrf.mxu2  ;;  %v1539_v40 = vpop.eup %1538  ;;  %v710_v56 = vmul.f32 %v1537_v4, %v1928_v51 }
 0x2ec   :  { %1542 = vrcp.f32 %v666_v8  ;;  %v709_v42 = vmul.f32 %v1539_v40, %v1934_v54 }
 0x2ed   :  { %1544 = vrcp.f32 %v663_v18  ;;  %v2205_v18 = vmul.f32 %v2195_v7, %v711_v6 }
 0x2ee   :  { %1546 = vrcp.f32 %v660_v25 }
 0x2ef   :  { %1548 = vrcp.f32 %v657_v2  ;;  %v2215_v2 = vmul.f32 %v2195_v7, %v709_v42 }
 0x2f0   :  { %1550 = vrcp.f32 %v654_v12 }
 0x2f1   :  { %v1541_v59 = vpop.eup %1540  ;;  %1552 = vrcp.f32 %v651_v60 }
 0x2f2   :  { %v712_v17 = vmul.f32 %v1541_v59, %v1915_v47  ;;  %v1543_v49 = vpop.eup %1542  ;;  %v2210_v47 = vmul.f32 %v2195_v7, %v710_v56  ;;  %v1115_v59 = vsub.f32 %v711_v6, %v2205_v18  ;;  %1554 = vrcp.f32 %v2156_v52 }
 0x2f3   :  { %v2199_v29 = vpop.f32.mrf.mxu2  ;;  %v1545_v9 = vpop.eup %1544  ;;  %v708_v51 = vmul.f32 %v1543_v49, %v1941_v58  ;;  %1556 = vrcp.f32 %v2148_v48 }
 0x2f4   :  { %v2202_v8 = vmul.f32 %v2195_v7, %v712_v17  ;;  %v1547_v4 = vpop.eup %1546  ;;  %v707_v25 = vmul.f32 %v1545_v9, %v1947_v53  ;;  %v1114_v12 = vsub.f32 %v710_v56, %v2210_v47  ;;  %1558 = vrcp.f32 %v2142_v46 }
 0x2f5   :  { %v1549_v54 = vpop.eup %1548  ;;  %v2221_v40 = vmul.f32 %v2195_v7, %v708_v51  ;;  %v706_v58 = vmul.f32 %v1547_v4, %v1954_v62  ;;  %1560 = vrcp.f32 %v2134_v15 }
 0x2f6   :  { %v1116_v30 = vsub.f32 %v712_v17, %v2202_v8  ;;  %v1551_v60 = vpop.eup %1550  ;;  %v1113_v17 = vsub.f32 %v709_v42, %v2215_v2  ;;  %v2229_v53 = vmul.f32 %v2195_v7, %v707_v25  ;;  %v705_v52 = vmul.f32 %v1549_v54, %v1960_v0 }
 0x2f7   :  { %v1553_v49 = vpop.eup %1552  ;;  %v1112_v56 = vsub.f32 %v708_v51, %v2221_v40  ;;  %v2235_v62 = vmul.f32 %v2195_v7, %v706_v58  ;;  %v704_v48 = vmul.f32 %v1551_v60, %v1967_v3  ;;  %1562 = vrcp.f32 %v2126_v19 }
 0x2f8   :  { %1117 = vmatpush.msra.mxu2 %v1116_v30  ;;  %v1555_v9 = vpop.eup %1554  ;;  %v1111_v42 = vsub.f32 %v707_v25, %v2229_v53  ;;  %v2241_v30 = vmul.f32 %v2195_v7, %v705_v52  ;;  %v703_v0 = vmul.f32 %v1553_v49, %v1973_v57  ;;  %1564 = vrcp.f32 %v2118_v13 }
 0x2f9   :  { %v1557_v46 = vpop.eup %1556  ;;  %v1110_v51 = vsub.f32 %v706_v58, %v2235_v62  ;;  %v2247_v4 = vmul.f32 %v2195_v7, %v704_v48  ;;  %v702_v3 = vmul.f32 %v1555_v9, %v1978_v24 }
 0x2fa   :  { %1118 = vmatpush.msra.mxu2 %v1115_v59  ;;  %v1559_v15 = vpop.eup %1558  ;;  %v1109_v25 = vsub.f32 %v705_v52, %v2241_v30  ;;  %v2255_v57 = vmul.f32 %v2195_v7, %v703_v0  ;;  %v701_v19 = vmul.f32 %v1557_v46, %v1982_v22 }
 0x2fb   :  { %v2225_v6 = vpop.f32.mrf.mxu2  ;;  %v1561_v54 = vpop.eup %1560  ;;  %v2260_v58 = vmul.f32 %v2195_v7, %v702_v3  ;;  %v700_v24 = vmul.f32 %v1559_v15, %v1987_v10 }
 0x2fc   :  { %1119 = vmatpush.msra.mxu2 %v1114_v12  ;;  %v1108_v12 = vsub.f32 %v704_v48, %v2247_v4  ;;  %v1107_v60 = vsub.f32 %v703_v0, %v2255_v57  ;;  %v699_v52 = vmul.f32 %v1561_v54, %v1991_v11 }
 0x2fd   :  { %v1563_v13 = vpop.eup %1562  ;;  %v1106_v22 = vsub.f32 %v702_v3, %v2260_v58 }
 0x2fe   :  { %1120 = vmatpush.msra.mxu2 %v1113_v17  ;;  %v2265_v17 = vmul.f32 %v2195_v7, %v701_v19  ;;  %v1565_v49 = vpop.eup %1564  ;;  %v698_v48 = vmul.f32 %v1563_v13, %v1996_v14 }
 0x2ff   :  { %v697_v0 = vmul.f32 %v1565_v49, %v2002_v16 }
 0x300   :  { %1121 = vmatpush.msra.mxu2 %v1112_v56  ;;  %v2270_v56 = vmul.f32 %v2195_v7, %v700_v24  ;;  %v1105_v10 = vsub.f32 %v701_v19, %v2265_v17  ;;  %v2280_v46 = vmul.f32 %v2195_v7, %v698_v48 }
 0x301   :  { %v2284_v14 = vmul.f32 %v2195_v7, %v697_v0 }
 0x302   :  { %1122 = vmatpush.msra.mxu2 %v1111_v42  ;;  %v2275_v42 = vmul.f32 %v2195_v7, %v699_v52  ;;  %v1104_v11 = vsub.f32 %v700_v24, %v2270_v56  ;;  %v1102_v3 = vsub.f32 %v698_v48, %v2280_v46 }
 0x303   :  { %v2251_v59 = vpop.f32.mrf.mxu2 }
 0x304   :  { %1123 = vmatpush.msra.mxu2 %v1110_v51  ;;  %v1103_v51 = vsub.f32 %v699_v52, %v2275_v42 }
 0x306   :  { %1124 = vmatpush.msra.mxu2 %v1109_v25  ;;  %v1101_v25 = vsub.f32 %v697_v0, %v2284_v14 }
 0x308   :  { %1125 = vmatpush.msra.mxu2 %v1108_v12 }
 0x30a   :  { %1126 = vmatpush.msra.mxu2 %v1107_v60 }
 0x30b   :  { %v837_v9 = vpop.f32.mrf.mxu2 }
 0x30c   :  { %1127 = vmatpush.msra.mxu2 %v1106_v22 }
 0x30e   :  { %1128 = vmatpush.msra.mxu2 %v1105_v10 }
 0x310   :  { %1129 = vmatpush.msra.mxu2 %v1104_v11 }
 0x312   :  { %1130 = vmatpush.msra.mxu2 %v1103_v51 }
 0x313   :  { %v840_v15 = vpop.f32.mrf.mxu2 }
 0x314   :  { %1131 = vmatpush.msra.mxu2 %v1102_v3 }
 0x316   :  { %1132 = vmatpush.msra.mxu2 %v1101_v25 }
 0x31b   :  { %v843_v16 = vpop.f32.mrf.mxu2 }
 0x323   :  { %v846_v19 = vpop.f32.mrf.mxu2 }
 0x32b   :  { %v849_v54 = vpop.f32.mrf.mxu2 }
 0x333   :  { %v852_v12 = vpop.f32.mrf.mxu2 }
 0x334   :  { %1566 = vrcp.f32 %v852_v12 }
 0x33a   :  { %v1567_v13 = vpop.eup %1566 }
 0x33b   :  { %v855_v24 = vpop.f32.mrf.mxu2  ;;  %v888_v49 = vmul.f32 %v1567_v13, %v2171_v32 }
 0x33c   :  { %1568 = vrcp.f32 %v855_v24 }
 0x33d   :  { %1570 = vrcp.f32 %v849_v54  ;;  %v905_v0 = vmul.f32 %v2195_v7, %v888_v49 }
 0x33e   :  { %1572 = vrcp.f32 %v846_v19 }
 0x33f   :  { %1574 = vrcp.f32 %v843_v16  ;;  %v921_v3 = vsub.f32 %v888_v49, %v905_v0 }
 0x340   :  { %1576 = vrcp.f32 %v840_v15 }
 0x341   :  { %1578 = vrcp.f32 %v837_v9 }
 0x342   :  { %v1569_v60 = vpop.eup %1568  ;;  %1580 = vrcp.f32 %v2251_v59 }
 0x343   :  { %v889_v52 = vmul.f32 %v1569_v60, %v2176_v31  ;;  %v1571_v22 = vpop.eup %1570  ;;  %1582 = vrcp.f32 %v2225_v6 }
 0x344   :  { %v887_v11 = vmul.f32 %v1571_v22, %v2165_v37  ;;  %v1573_v51 = vpop.eup %1572  ;;  %1584 = vrcp.f32 %v2199_v29 }
 0x345   :  { %v906_v48 = vmul.f32 %v2195_v7, %v889_v52  ;;  %v886_v31 = vmul.f32 %v1573_v51, %v2161_v61  ;;  %v1575_v32 = vpop.eup %1574  ;;  %1586 = vrcp.f32 %v2191_v20 }
 0x346   :  { %v904_v25 = vmul.f32 %v2195_v7, %v887_v11  ;;  %v885_v54 = vmul.f32 %v1575_v32, %v2153_v44  ;;  %v1577_v12 = vpop.eup %1576  ;;  %1588 = vrcp.f32 %v2189_v43 }
 0x347   :  { %923 = vmatpush.xpose.msra.mxu3 %v906_v48  ;;  %v922_v10 = vsub.f32 %v889_v52, %v906_v48  ;;  %v903_v19 = vmul.f32 %v2195_v7, %v886_v31  ;;  %v884_v24 = vmul.f32 %v1577_v12, %v2145_v34  ;;  %v1579_v61 = vpop.eup %1578  ;;  %1590 = vrcp.f32 %v2187_v38 }
 0x348   :  { %v920_v16 = vsub.f32 %v887_v11, %v904_v25  ;;  %v902_v15 = vmul.f32 %v2195_v7, %v885_v54  ;;  %v883_v44 = vmul.f32 %v1579_v61, %v2137_v33  ;;  %v1581_v60 = vpop.eup %1580  ;;  %1592 = vrcp.f32 %v2185_v63 }
 0x349   :  { %1004 = vmatpush.xpose.msrb.mxu1 %v922_v10  ;;  %v919_v37 = vsub.f32 %v886_v31, %v903_v19  ;;  %v901_v13 = vmul.f32 %v2195_v7, %v884_v24  ;;  %v882_v34 = vmul.f32 %v1581_v60, %v2129_v5  ;;  %v1583_v49 = vpop.eup %1582  ;;  %1594 = vrcp.f32 %v2183_v28  ;;  %v2496_v60 = vld [vmem:[#allocation18_spill] sm:$0xff] }
 0x34a   :  { %v918_v9 = vsub.f32 %v885_v54, %v902_v15  ;;  %v900_v52 = vmul.f32 %v2195_v7, %v883_v44  ;;  %v881_v33 = vmul.f32 %v1583_v49, %v2123_v36  ;;  %v1585_v48 = vpop.eup %1584  ;;  %1596 = vrcp.f32 %v2181_v1  ;;  %v499_v54 = vpop.f32.mrf.mxu0 }
 0x34b   :  { %924 = vmatpush.xpose.msra.mxu3 %v905_v0  ;;  %v917_v59 = vsub.f32 %v884_v24, %v901_v13  ;;  %v899_v22 = vmul.f32 %v2195_v7, %v882_v34  ;;  %v880_v5 = vmul.f32 %v1585_v48, %v2115_v41  ;;  %v1587_v0 = vpop.eup %1586 }
 0x34c   :  { %v916_v6 = vsub.f32 %v883_v44, %v900_v52  ;;  %v898_v10 = vmul.f32 %v2195_v7, %v881_v33  ;;  %v879_v36 = vmul.f32 %v1587_v0, %v2108_v23  ;;  %v1589_v51 = vpop.eup %1588 }
 0x34d   :  { %1005 = vmatpush.xpose.msrb.mxu1 %v921_v3  ;;  %v915_v29 = vsub.f32 %v882_v34, %v899_v22  ;;  %v897_v11 = vmul.f32 %v2195_v7, %v880_v5  ;;  %v878_v41 = vmul.f32 %v1589_v51, %v2101_v26 }
 0x34e   :  { %v914_v20 = vsub.f32 %v881_v33, %v898_v10  ;;  %v896_v3 = vmul.f32 %v2195_v7, %v879_v36 }
 0x34f   :  { %925 = vmatpush.xpose.msra.mxu3 %v904_v25  ;;  %v913_v43 = vsub.f32 %v880_v5, %v897_v11  ;;  %v1591_v25 = vpop.eup %1590  ;;  %v895_v31 = vmul.f32 %v2195_v7, %v878_v41 }
 0x350   :  { %v912_v38 = vsub.f32 %v879_v36, %v896_v3  ;;  %v877_v23 = vmul.f32 %v1591_v25, %v2094_v55  ;;  %v1593_v32 = vpop.eup %1592  ;;  %v2499_v36 = vld [vmem:[#allocation21_spill] sm:$0xff]  ;;  %v2500_v25 = vld [vmem:[#allocation22_spill] sm:$0xff] }
 0x351   :  { %1006 = vmatpush.xpose.msrb.mxu1 %v920_v16  ;;  %v911_v63 = vsub.f32 %v878_v41, %v895_v31  ;;  %v876_v26 = vmul.f32 %v1593_v32, %v2087_v45 }
 0x352   :  { %v894_v16 = vmul.f32 %v2195_v7, %v877_v23 }
 0x353   :  { %926 = vmatpush.xpose.msra.mxu3 %v903_v19  ;;  %v1595_v19 = vpop.eup %1594  ;;  %v893_v12 = vmul.f32 %v2195_v7, %v876_v26 }
 0x354   :  { %v910_v28 = vsub.f32 %v877_v23, %v894_v16  ;;  %v1597_v55 = vpop.eup %1596 }
 0x355   :  { %1007 = vmatpush.xpose.msrb.mxu1 %v919_v37  ;;  %v875_v37 = vmul.f32 %v1595_v19, %v2080_v39  ;;  %v874_v24 = vmul.f32 %v1597_v55, %v2073_v27 }
 0x357   :  { %927 = vmatpush.xpose.msra.mxu3 %v902_v15  ;;  %v909_v15 = vsub.f32 %v876_v26, %v893_v12  ;;  %v892_v1 = vmul.f32 %v2195_v7, %v875_v37  ;;  %v891_v61 = vmul.f32 %v2195_v7, %v874_v24 }
 0x359   :  { %1008 = vmatpush.xpose.msrb.mxu1 %v918_v9  ;;  %v908_v45 = vsub.f32 %v875_v37, %v892_v1  ;;  %v502_v9 = vpop.f32.mrf.mxu0 }
 0x35b   :  { %928 = vmatpush.xpose.msra.mxu3 %v901_v13  ;;  %v907_v13 = vsub.f32 %v874_v24, %v891_v61 }
 0x35d   :  { %1009 = vmatpush.xpose.msrb.mxu1 %v917_v59 }
 0x35f   :  { %929 = vmatpush.xpose.msra.mxu3 %v900_v52 }
 0x361   :  { %1010 = vmatpush.xpose.msrb.mxu1 %v916_v6  ;;  %v505_v39 = vpop.f32.mrf.mxu0  ;;  %v2497_v6 = vld [vmem:[#allocation19_spill] sm:$0xff] }
 0x363   :  { %930 = vmatpush.xpose.msra.mxu3 %v899_v22 }
 0x365   :  { %1011 = vmatpush.xpose.msrb.mxu1 %v915_v29 }
 0x367   :  { %931 = vmatpush.xpose.msra.mxu3 %v898_v10  ;;  %v2498_v10 = vld [vmem:[#allocation20_spill] sm:$0xff] }
 0x369   :  { %1012 = vmatpush.xpose.msrb.mxu1 %v914_v20  ;;  %v508_v27 = vpop.f32.mrf.mxu0 }
 0x36b   :  { %932 = vmatpush.xpose.msra.mxu3 %v897_v11 }
 0x36d   :  { %1013 = vmatpush.xpose.msrb.mxu1 %v913_v43 }
 0x36f   :  { %933 = vmatpush.xpose.msra.mxu3 %v896_v3 }
 0x371   :  { %1014 = vmatpush.xpose.msrb.mxu1 %v912_v38 }
 0x373   :  { %934 = vmatpush.xpose.msra.mxu3 %v895_v31 }
 0x375   :  { %1015 = vmatpush.xpose.msrb.mxu1 %v911_v63  ;;  %v2501_v63 = vld [vmem:[#allocation23_spill] sm:$0xff] }
 0x377   :  { %935 = vmatpush.xpose.msra.mxu3 %v894_v16 }
 0x379   :  { %1016 = vmatpush.xpose.msrb.mxu1 %v910_v28  ;;  %v2502_v28 = vld [vmem:[#allocation24_spill] sm:$0xff] }
 0x37b   :  { %936 = vmatpush.xpose.msra.mxu3 %v893_v12 }
 0x37d   :  { %1017 = vmatpush.xpose.msrb.mxu1 %v909_v15 }
 0x37f   :  { %937 = vmatpush.xpose.msra.mxu3 %v892_v1  ;;  %v2503_v1 = vld [vmem:[#allocation25_spill] sm:$0xff] }
 0x381   :  { %1018 = vmatpush.xpose.msrb.mxu1 %v908_v45 }
 0x383   :  { %938 = vmatpush.xpose.msra.mxu3 %v891_v61 }
 0x385   :  { %1019 = vmatpush.xpose.msrb.mxu1 %v907_v13  ;;  %v2504_v13 = vld [vmem:[#allocation26_spill] sm:$0xff] }
 0x386   :  { %939 = vmatmul.f32.vlgmr.msra.gmra.mxu3 %v499_v54 }
 0x387   :  { %1182 = vmatpush.msrb.mxu3 %v2202_v8  ;;  %v511_v8 = vpop.f32.mrf.mxu0 }
 0x388   :  { %1020 = vmatmul.f32.vlgmr.msrb.gmra.mxu1 %v499_v54 }
 0x389   :  { %1183 = vmatpush.msrb.mxu3 %v2205_v18 }
 0x38b   :  { %1184 = vmatpush.msrb.mxu3 %v2210_v47 }
 0x38d   :  { %1185 = vmatpush.msrb.mxu3 %v2215_v2 }
 0x38e   :  { %942 = vmatmul.f32.gmra.mxu3 %v502_v9 }
 0x38f   :  { %1186 = vmatpush.msrb.mxu3 %v2221_v40  ;;  %v514_v18 = vpop.f32.mrf.mxu0  ;;  %v2489_v40 = vld [vmem:[#allocation32_spill] sm:$0xff] }
 0x390   :  { %1023 = vmatmul.f32.gmra.mxu1 %v502_v9 }
 0x391   :  { %1187 = vmatpush.msrb.mxu3 %v2229_v53  ;;  %v2490_v53 = vld [vmem:[#allocation33_spill] sm:$0xff] }
 0x393   :  { %1188 = vmatpush.msrb.mxu3 %v2235_v62  ;;  %v2491_v62 = vld [vmem:[#allocation34_spill] sm:$0xff] }
 0x395   :  { %1189 = vmatpush.msrb.mxu3 %v2241_v30  ;;  %v2494_v30 = vld [vmem:[#allocation16_spill] sm:$0xff] }
 0x396   :  { %945 = vmatmul.f32.gmra.mxu3 %v505_v39 }
 0x397   :  { %1190 = vmatpush.msrb.mxu3 %v2247_v4  ;;  %v517_v47 = vpop.f32.mrf.mxu0 }
 0x398   :  { %1026 = vmatmul.f32.gmra.mxu1 %v505_v39 }
 0x399   :  { %1191 = vmatpush.msrb.mxu3 %v2255_v57 }
 0x39b   :  { %1192 = vmatpush.msrb.mxu3 %v2260_v58 }
 0x39d   :  { %1193 = vmatpush.msrb.mxu3 %v2265_v17 }
 0x39e   :  { %948 = vmatmul.f32.gmra.mxu3 %v508_v27 }
 0x39f   :  { %1194 = vmatpush.msrb.mxu3 %v2270_v56  ;;  %v520_v2 = vpop.f32.mrf.mxu0  ;;  %v2495_v56 = vld [vmem:[#allocation17_spill] sm:$0xff] }
 0x3a0   :  { %1029 = vmatmul.f32.gmra.mxu1 %v508_v27 }
 0x3a1   :  { %1195 = vmatpush.msrb.mxu3 %v2275_v42 }
 0x3a3   :  { %1196 = vmatpush.msrb.mxu3 %v2280_v46 }
 0x3a5   :  { %1197 = vmatpush.msrb.mxu3 %v2284_v14 }
 0x3a6   :  { %951 = vmatmul.f32.gmra.mxu3 %v511_v8 }
 0x3a8   :  { %1032 = vmatmul.f32.gmra.mxu1 %v511_v8 }
 0x3ae   :  { %954 = vmatmul.f32.gmra.mxu3 %v514_v18 }
 0x3b0   :  { %1035 = vmatmul.f32.gmra.mxu1 %v514_v18 }
 0x3b6   :  { %957 = vmatmul.f32.gmra.mxu3 %v517_v47 }
 0x3b8   :  { %1038 = vmatmul.f32.gmra.mxu1 %v517_v47  ;;  %v2505_v47 = vld [vmem:[#allocation27_spill] sm:$0xff] }
 0x3be   :  { %960 = vmatmul.f32.gmra.mxu3 %v520_v2 }
 0x3c0   :  { %1041 = vmatmul.f32.gmra.mxu1 %v520_v2 }
 0x3c6   :  { %963 = vmatmul.f32.gmra.mxu3 %v2121_v50 }
 0x3c8   :  { %1044 = vmatmul.f32.gmra.mxu1 %v2121_v50  ;;  %v2492_v50 = vld [vmem:[#allocation35_spill] sm:$0xff] }
 0x3ce   :  { %966 = vmatmul.f32.gmra.mxu3 %v2131_v21 }
 0x3d0   :  { %1047 = vmatmul.f32.gmra.mxu1 %v2131_v21  ;;  %v2493_v21 = vld [vmem:[#allocation36_spill] sm:$0xff] }
 0x3d6   :  { %969 = vmatmul.f32.gmra.mxu3 %v2140_v35 }
 0x3d8   :  { %1050 = vmatmul.f32.gmra.mxu1 %v2140_v35 }
 0x3de   :  { %972 = vmatmul.f32.gmra.mxu3 %v2489_v40 }
 0x3e0   :  { %1053 = vmatmul.f32.gmra.mxu1 %v2489_v40 }
 0x3e6   :  { %975 = vmatmul.f32.gmra.mxu3 %v2490_v53 }
 0x3e8   :  { %1056 = vmatmul.f32.gmra.mxu1 %v2490_v53 }
 0x3ee   :  { %978 = vmatmul.f32.gmra.mxu3 %v2491_v62 }
 0x3f0   :  { %1059 = vmatmul.f32.gmra.mxu1 %v2491_v62 }
 0x3f6   :  { %981 = vmatmul.f32.gmra.mxu3 %v2492_v50 }
 0x3f8   :  { %1062 = vmatmul.f32.gmra.mxu1 %v2492_v50  ;;  %v2506_v50 = vld [vmem:[#allocation28_spill] sm:$0xff] }
 0x3fe   :  { %984 = vmatmul.f32.gmra.mxu3 %v2493_v21 }
 0x400   :  { %1065 = vmatmul.f32.gmra.mxu1 %v2493_v21 }
 0x405   :  { %v1021_v35 = vpop.f32.mrf.mxu1 }
 0x406   :  { %v1069_v4 = vmul.f32 %v1021_v35, %v2494_v30 }
 0x408   :  { %1133 = vmatmul.f32.vlgmr.msra.gmra.mxu2 %v1069_v4 }
 0x409   :  { %v940_v57 = vpop.f32.mrf.mxu3 }
 0x40a   :  { %v988_v58 = vmul.f32 %v940_v57, %v2494_v30  ;;  %v2507_v57 = vld [vmem:[#allocation29_spill] sm:$0xff] }
 0x40c   :  { %1198 = vmatmul.f32.vlgmr.msrb.gmra.mxu3 %v988_v58 }
 0x40d   :  { %v1024_v17 = vpop.f32.mrf.mxu1 }
 0x40e   :  { %v1070_v42 = vmul.f32 %v1024_v17, %v2495_v56 }
 0x410   :  { %1136 = vmatmul.f32.gmra.mxu2 %v1070_v42 }
 0x411   :  { %v943_v46 = vpop.f32.mrf.mxu3 }
 0x412   :  { %v989_v14 = vmul.f32 %v943_v46, %v2495_v56  ;;  %v2508_v46 = vld [vmem:[#allocation30_spill] sm:$0xff] }
 0x414   :  { %1201 = vmatmul.f32.gmra.mxu3 %v989_v14 }
 0x415   :  { %v1027_v44 = vpop.f32.mrf.mxu1 }
 0x416   :  { %v1071_v59 = vmul.f32 %v1027_v44, %v2496_v60 }
 0x418   :  { %1139 = vmatmul.f32.gmra.mxu2 %v1071_v59 }
 0x419   :  { %v946_v52 = vpop.f32.mrf.mxu3 }
 0x41a   :  { %v990_v34 = vmul.f32 %v946_v52, %v2496_v60  ;;  %v2509_v52 = vld [vmem:[#allocation31_spill] sm:$0xff] }
 0x41c   :  { %1204 = vmatmul.f32.gmra.mxu3 %v990_v34 }
 0x41d   :  { %v1030_v49 = vpop.f32.mrf.mxu1 }
 0x41e   :  { %v1072_v22 = vmul.f32 %v1030_v49, %v2497_v6 }
 0x420   :  { %1142 = vmatmul.f32.gmra.mxu2 %v1072_v22 }
 0x421   :  { %v949_v33 = vpop.f32.mrf.mxu3 }
 0x422   :  { %v991_v48 = vmul.f32 %v949_v33, %v2497_v6 }
 0x424   :  { %1207 = vmatmul.f32.gmra.mxu3 %v991_v48 }
 0x425   :  { %v1033_v29 = vpop.f32.mrf.mxu1 }
 0x426   :  { %v1073_v5 = vmul.f32 %v1033_v29, %v2498_v10 }
 0x428   :  { %1145 = vmatmul.f32.gmra.mxu2 %v1073_v5 }
 0x429   :  { %v952_v0 = vpop.f32.mrf.mxu3 }
 0x42a   :  { %v992_v20 = vmul.f32 %v952_v0, %v2498_v10 }
 0x42c   :  { %1210 = vmatmul.f32.gmra.mxu3 %v992_v20 }
 0x42d   :  { %v1036_v11 = vpop.f32.mrf.mxu1 }
 0x42e   :  { %v1074_v51 = vmul.f32 %v1036_v11, %v2499_v36 }
 0x430   :  { %1148 = vmatmul.f32.gmra.mxu2 %v1074_v51 }
 0x431   :  { %v955_v43 = vpop.f32.mrf.mxu3 }
 0x432   :  { %v993_v3 = vmul.f32 %v955_v43, %v2499_v36 }
 0x434   :  { %1213 = vmatmul.f32.gmra.mxu3 %v993_v3 }
 0x435   :  { %v1039_v41 = vpop.f32.mrf.mxu1 }
 0x436   :  { %v1075_v38 = vmul.f32 %v1039_v41, %v2500_v25 }
 0x438   :  { %1151 = vmatmul.f32.gmra.mxu2 %v1075_v38 }
 0x439   :  { %v958_v31 = vpop.f32.mrf.mxu3 }
 0x43a   :  { %v994_v23 = vmul.f32 %v958_v31, %v2500_v25 }
 0x43c   :  { %1216 = vmatmul.f32.gmra.mxu3 %v994_v23 }
 0x43d   :  { %v1042_v32 = vpop.f32.mrf.mxu1 }
 0x43e   :  { %v1076_v16 = vmul.f32 %v1042_v32, %v2501_v63 }
 0x440   :  { %1154 = vmatmul.f32.gmra.mxu2 %v1076_v16 }
 0x441   :  { %v961_v26 = vpop.f32.mrf.mxu3 }
 0x442   :  { %v995_v19 = vmul.f32 %v961_v26, %v2501_v63 }
 0x444   :  { %1219 = vmatmul.f32.gmra.mxu3 %v995_v19 }
 0x445   :  { %v1045_v54 = vpop.f32.mrf.mxu1 }
 0x446   :  { %v1077_v12 = vmul.f32 %v1045_v54, %v2502_v28 }
 0x448   :  { %1157 = vmatmul.f32.gmra.mxu2 %v1077_v12 }
 0x449   :  { %v964_v37 = vpop.f32.mrf.mxu3 }
 0x44a   :  { %v996_v55 = vmul.f32 %v964_v37, %v2502_v28 }
 0x44c   :  { %1222 = vmatmul.f32.gmra.mxu3 %v996_v55 }
 0x44d   :  { %v1048_v15 = vpop.f32.mrf.mxu1 }
 0x44e   :  { %v1078_v24 = vmul.f32 %v1048_v15, %v2503_v1 }
 0x450   :  { %1160 = vmatmul.f32.gmra.mxu2 %v1078_v24 }
 0x451   :  { %v967_v45 = vpop.f32.mrf.mxu3 }
 0x452   :  { %v997_v61 = vmul.f32 %v967_v45, %v2503_v1 }
 0x454   :  { %1225 = vmatmul.f32.gmra.mxu3 %v997_v61 }
 0x455   :  { %v1051_v9 = vpop.f32.mrf.mxu1 }
 0x456   :  { %v1079_v39 = vmul.f32 %v1051_v9, %v2504_v13 }
 0x458   :  { %1163 = vmatmul.f32.gmra.mxu2 %v1079_v39 }
 0x459   :  { %v970_v27 = vpop.f32.mrf.mxu3 }
 0x45a   :  { %v998_v8 = vmul.f32 %v970_v27, %v2504_v13 }
 0x45c   :  { %1228 = vmatmul.f32.gmra.mxu3 %v998_v8 }
 0x45d   :  { %v1054_v18 = vpop.f32.mrf.mxu1 }
 0x45e   :  { %v1080_v2 = vmul.f32 %v1054_v18, %v2505_v47 }
 0x460   :  { %1166 = vmatmul.f32.gmra.mxu2 %v1080_v2 }
 0x461   :  { %v973_v40 = vpop.f32.mrf.mxu3 }
 0x462   :  { %v999_v53 = vmul.f32 %v973_v40, %v2505_v47 }
 0x464   :  { %1231 = vmatmul.f32.gmra.mxu3 %v999_v53  ;;  %v2395_v53 = vld [vmem:[#allocation8] sm:$0xf] }
 0x465   :  { %v1057_v62 = vpop.f32.mrf.mxu1 }
 0x466   :  { %v1081_v21 = vmul.f32 %v1057_v62, %v2506_v50 }
 0x468   :  { %1169 = vmatmul.f32.gmra.mxu2 %v1081_v21 }
 0x469   :  { %v976_v35 = vpop.f32.mrf.mxu3 }
 0x46a   :  { %v1000_v30 = vmul.f32 %v976_v35, %v2506_v50  ;;  %v1762_v50 = vmov 0  }
 0x46b   :  { %1466 = vset.pattern.permute.xlu2 %v1762_v50 }
 0x46c   :  { %1234 = vmatmul.f32.gmra.mxu3 %v1000_v30  ;;  %1249 = vperm.xlu2 %1466, %v2395_v53  }
 0x46d   :  { %v1060_v4 = vpop.f32.mrf.mxu1 }
 0x46e   :  { %v1082_v58 = vmul.f32 %v1060_v4, %v2507_v57 }
 0x470   :  { %1172 = vmatmul.f32.gmra.mxu2 %v1082_v58  ;;  %v94_v58 = vld [vmem:[#allocation7] sm:$0xf] }
 0x471   :  { %v979_v17 = vpop.f32.mrf.mxu3 }
 0x472   :  { %v1001_v56 = vmul.f32 %v979_v17, %v2507_v57  ;;  %v2399_v17 = vld [vmem:[#allocation10 + $0x80] sm:$0xff] }
 0x474   :  { %1237 = vmatmul.f32.gmra.mxu3 %v1001_v56  ;;  %v2402_v56 = vsub.f32 1.0, %v2399_v17 }
 0x475   :  { %v1063_v42 = vpop.f32.mrf.mxu1 }
 0x476   :  { %v1083_v14 = vmul.f32 %v1063_v42, %v2508_v46 }
 0x478   :  { %1175 = vmatmul.f32.gmra.mxu2 %v1083_v14 }
 0x479   :  { %v982_v44 = vpop.f32.mrf.mxu3 }
 0x47a   :  { %v1002_v60 = vmul.f32 %v982_v44, %v2508_v46  ;;  %v1284_v46 = vperm.slane %v2402_v56, 0 }
 0x47c   :  { %1240 = vmatmul.f32.gmra.mxu3 %v1002_v60 }
 0x47d   :  { %v1066_v59 = vpop.f32.mrf.mxu1 }
 0x47e   :  { %v1084_v34 = vmul.f32 %v1066_v59, %v2509_v52 }
 0x480   :  { %1178 = vmatmul.f32.gmra.mxu2 %v1084_v34 }
 0x481   :  { %v985_v49 = vpop.f32.mrf.mxu3 }
 0x482   :  { %v1003_v6 = vmul.f32 %v985_v49, %v2509_v52 }
 0x484   :  { %1243 = vmatmul.f32.gmra.mxu3 %v1003_v6 }
 0x48b   :  { %v1134_v22 = vpop.f32.mrf.mxu2 }
 0x48f   :  { %v1199_v33 = vpop.f32.mrf.mxu3 }
 0x490   :  { %v2393_v48 = vadd.f32 %v1199_v33, %v1134_v22 }
 0x493   :  { %v1137_v29 = vpop.f32.mrf.mxu2 }
 0x497   :  { %v1202_v10 = vpop.f32.mrf.mxu3 }
 0x498   :  { %v1203_v5 = vadd.f32 %v1202_v10, %v1137_v29 }
 0x49b   :  { %v1140_v0 = vpop.f32.mrf.mxu2 }
 0x49f   :  { %v1205_v20 = vpop.f32.mrf.mxu3 }
 0x4a0   :  { %v1206_v11 = vadd.f32 %v1205_v20, %v1140_v0 }
 0x4a3   :  { %v1143_v36 = vpop.f32.mrf.mxu2 }
 0x4a7   :  { %v1208_v51 = vpop.f32.mrf.mxu3 }
 0x4a8   :  { %v1209_v43 = vadd.f32 %v1208_v51, %v1143_v36 }
 0x4ab   :  { %v1146_v3 = vpop.f32.mrf.mxu2 }
 0x4af   :  { %v1211_v41 = vpop.f32.mrf.mxu3 }
 0x4b0   :  { %v1212_v25 = vadd.f32 %v1211_v41, %v1146_v3 }
 0x4b3   :  { %v1149_v38 = vpop.f32.mrf.mxu2 }
 0x4b7   :  { %v1214_v31 = vpop.f32.mrf.mxu3 }
 0x4b8   :  { %v1215_v23 = vadd.f32 %v1214_v31, %v1149_v38 }
 0x4bb   :  { %v1152_v32 = vpop.f32.mrf.mxu2 }
 0x4bf   :  { %v1217_v63 = vpop.f32.mrf.mxu3 }
 0x4c0   :  { %v1218_v16 = vadd.f32 %v1217_v63, %v1152_v32 }
 0x4c3   :  { %v1155_v26 = vpop.f32.mrf.mxu2 }
 0x4c6   :  { %v1250_v42 = vpop.permute.xlu2 %1249 }
 0x4c7   :  { %v1220_v19 = vpop.f32.mrf.mxu3 }
 0x4c8   :  { %v1221_v54 = vadd.f32 %v1220_v19, %v1155_v26 }
 0x4cb   :  { %v1158_v28 = vpop.f32.mrf.mxu2 }
 0x4cf   :  { %v1223_v12 = vpop.f32.mrf.mxu3 }
 0x4d0   :  { %v1224_v37 = vadd.f32 %v1223_v12, %v1158_v28  ;;  %v1763_v28 = vmov 2   ;;  %v1764_v12 = vmov 1  }
 0x4d1   :  { %1468 = vset.pattern.permute.xlu1 %v1763_v28  ;;  %1467 = vset.pattern.permute.xlu2 %v1764_v12 }
 0x4d2   :  { %1368 = vperm.xlu1 %1468, %v2395_v53   ;;  %1469 = vset.pattern.permute.xlu0 %v1763_v28 }
 0x4d3   :  { %v1161_v55 = vpop.f32.mrf.mxu2 }
 0x4d7   :  { %v1226_v15 = vpop.f32.mrf.mxu3 }
 0x4d8   :  { %v1227_v57 = vadd.f32 %v1226_v15, %v1161_v55 }
 0x4db   :  { %v1164_v1 = vpop.f32.mrf.mxu2 }
 0x4df   :  { %v1229_v24 = vpop.f32.mrf.mxu3 }
 0x4e0   :  { %v1230_v4 = vadd.f32 %v1229_v24, %v1164_v1 }
 0x4e3   :  { %v1167_v45 = vpop.f32.mrf.mxu2 }
 0x4e7   :  { %v1232_v61 = vpop.f32.mrf.mxu3 }
 0x4e8   :  { %v1233_v30 = vadd.f32 %v1232_v61, %v1167_v45 }
 0x4eb   :  { %v1170_v9 = vpop.f32.mrf.mxu2 }
 0x4ef   :  { %v1235_v13 = vpop.f32.mrf.mxu3 }
 0x4f0   :  { %v1236_v35 = vadd.f32 %v1235_v13, %v1170_v9 }
 0x4f3   :  { %v1173_v39 = vpop.f32.mrf.mxu2 }
 0x4f7   :  { %v1238_v27 = vpop.f32.mrf.mxu3 }
 0x4f8   :  { %v1239_v21 = vadd.f32 %v1238_v27, %v1173_v39 }
 0x4fb   :  { %v1176_v8 = vpop.f32.mrf.mxu2 }
 0x4ff   :  { %v1241_v18 = vpop.f32.mrf.mxu3 }
 0x500   :  { %v1242_v62 = vadd.f32 %v1241_v18, %v1176_v8 }
 0x503   :  { %v1179_v47 = vpop.f32.mrf.mxu2 }
 0x507   :  { %v1244_v2 = vpop.f32.mrf.mxu3 }
 0x508   :  { %v1245_v40 = vadd.f32 %v1244_v2, %v1179_v47 }
 0x50a   :  { %1252 = vmatpush.msra.mxu1 %v1245_v40 }
 0x50c   :  { %1253 = vmatpush.msra.mxu1 %v1242_v62 }
 0x50e   :  { %1254 = vmatpush.msra.mxu1 %v1239_v21 }
 0x510   :  { %1255 = vmatpush.msra.mxu1 %v1236_v35 }
 0x512   :  { %1256 = vmatpush.msra.mxu1 %v1233_v30 }
 0x514   :  { %1257 = vmatpush.msra.mxu1 %v1230_v4 }
 0x516   :  { %1258 = vmatpush.msra.mxu1 %v1227_v57 }
 0x518   :  { %1259 = vmatpush.msra.mxu1 %v1224_v37 }
 0x51a   :  { %1260 = vmatpush.msra.mxu1 %v1221_v54 }
 0x51c   :  { %1261 = vmatpush.msra.mxu1 %v1218_v16 }
 0x51e   :  { %1262 = vmatpush.msra.mxu1 %v1215_v23 }
 0x520   :  { %1263 = vmatpush.msra.mxu1 %v1212_v25 }
 0x522   :  { %1264 = vmatpush.msra.mxu1 %v1209_v43 }
 0x524   :  { %1265 = vmatpush.msra.mxu1 %v1206_v11 }
 0x526   :  { %1266 = vmatpush.msra.mxu1 %v1203_v5 }
 0x528   :  { %1267 = vmatpush.msra.mxu1 %v2393_v48 }
 0x529   :  { %1268 = vmatmul.f32.vlgmr.msra.gmra.mxu1 %v94_v58 }
 0x5a6   :  { %v1269_v14 = vpop.f32.mrf.mxu1 }
 0x5a7   :  { %v1270_v44 = vadd.f32 %v1269_v14, %v1250_v42 }
 0x5a9   :  { %v1285_v60 = vmul.f32 %v1284_v46, %v1270_v44  ;;  %v1272_v59 = vmul.f32 %v1270_v44, %v2195_v7 }
 0x5ab   :  { %v1286_v52 = vsel %vm382_vm0, %v1285_v60, 0.0  ;;  %v1273_v34 = vsel %vm382_vm0, %v1272_v59, 0.0 }
 0x5ac   :  { %1287 = vadd.xlane.f32.xlu2 %v1286_v52  ;;  %1274 = vadd.xlane.f32.xlu0 %v1273_v34 }
 0x61f   :  { %v1288_v49 = vpop.xlane.xlu2 %1287  ;;  %v1275_v6 = vpop.xlane.xlu0 %1274 }
 0x620   :  { %v1289_v22 = vrot.slane %v1288_v49, 4  ;;  %v1276_v33 = vrot.slane %v1275_v6, 4 }
 0x622   :  { %v1290_v48 = vadd.f32 %v1289_v22, %v1288_v49  ;;  %v1277_v29 = vadd.f32 %v1276_v33, %v1275_v6 }
 0x624   :  { %v1291_v10 = vrot.slane %v1290_v48, 2  ;;  %v1278_v5 = vrot.slane %v1277_v29, 2 }
 0x626   :  { %v1279_v0 = vadd.f32 %v1278_v5, %v1277_v29  ;;  %v1292_v20 = vadd.f32 %v1291_v10, %v1290_v48  ;;  %v1369_v48 = vpop.permute.xlu1 %1368 }
 0x628   :  { %v1280_v11 = vrot.slane %v1279_v0, 1  ;;  %v1293_v36 = vrot.slane %v1292_v20, 1 }
 0x62a   :  { %v1281_v51 = vadd.f32 %v1280_v11, %v1279_v0  ;;  %v1294_v43 = vadd.f32 %v1293_v36, %v1292_v20 }
 0x62c   :  { %1442 = vpush %v1281_v51 }
 0x62d   :  { %1444 = vpush %v1294_v43 }
 0x65d   :  { %s1443_s2 = spop %1442 }
 0x65e   :  { %s1283_s4 = smul.f32 0.00390625, %s1443_s2  ;;  %s1445_s17 = spop %1444 }
 0x65f   :  { %s1296_s18 = smul.f32 0.00390625, %s1445_s17 }
 0x660   :  { %v1297_v3 = vstv %s1283_s4 }
 0x661   :  { %v1298_v41 = vmul.f32 %v2399_v17, %v1297_v3  ;;  %v1299_v25 = vstv %s1296_s18 }
 0x662   :  { %v1300_v38 = vmul.f32 %v1299_v25, %v2402_v56 }
 0x664   :  { %v1301_v31 = vadd.f32 %v1300_v38, %v1298_v41 }
 0x666   :  { %v1302_v23 = vperm.slane %v1301_v31, 0 }
 0x668   :  { %v2410_v32 = vsub.f32 %v1270_v44, %v1302_v23 }
 0x66a   :  { %v1304_v63 = vmul.f32 %v2410_v32, %v2410_v32 }
 0x66c   :  { %v1305_v16 = vmul.f32 %v1304_v63, %v2195_v7  ;;  %v1317_v19 = vmul.f32 %v1304_v63, %v1284_v46 }
 0x66e   :  { %v1306_v26 = vsel %vm382_vm0, %v1305_v16, 0.0  ;;  %v1318_v54 = vsel %vm382_vm0, %v1317_v19, 0.0 }
 0x66f   :  { %1307 = vadd.xlane.f32.xlu2 %v1306_v26 }
 0x677   :  { %1319 = vadd.xlane.f32.xlu2 %v1318_v54 }
 0x68f   :  { %1363 = vperm.xlu2 %1467, %v2395_v53  }
 0x6e2   :  { %v1308_v37 = vpop.xlane.xlu2 %1307 }
 0x6e3   :  { %v1309_v55 = vrot.slane %v1308_v37, 4 }
 0x6e5   :  { %v1310_v15 = vadd.f32 %v1309_v55, %v1308_v37 }
 0x6e7   :  { %v1311_v7 = vrot.slane %v1310_v15, 2 }
 0x6e9   :  { %v1312_v1 = vadd.f32 %v1311_v7, %v1310_v15 }
 0x6ea   :  { %v1320_v24 = vpop.xlane.xlu2 %1319 }
 0x6eb   :  { %v1321_v45 = vrot.slane %v1320_v24, 4  ;;  %v1313_v61 = vrot.slane %v1312_v1, 1 }
 0x6ed   :  { %v1322_v9 = vadd.f32 %v1321_v45, %v1320_v24  ;;  %v1314_v13 = vadd.f32 %v1313_v61, %v1312_v1 }
 0x6ef   :  { %v1323_v39 = vrot.slane %v1322_v9, 2  ;;  %1446 = vpush %v1314_v13 }
 0x6f1   :  { %v1324_v27 = vadd.f32 %v1323_v39, %v1322_v9 }
 0x6f2   :  { %v1364_v22 = vpop.permute.xlu2 %1363 }
 0x6f3   :  { %v1325_v8 = vrot.slane %v1324_v27, 1 }
 0x6f5   :  { %v1326_v18 = vadd.f32 %v1325_v8, %v1324_v27 }
 0x6f7   :  { %1448 = vpush %v1326_v18 }
 0x720   :  { %s1447_s19 = spop %1446 }
 0x721   :  { %s1316_s20 = smul.f32 0.00390625, %s1447_s19 }
 0x723   :  { %s1329_s21 = sadd.f32 1e-05, %s1316_s20 }
 0x725   :  { %v1330_v47 = vstv %s1329_s21 }
 0x726   :  { %1598 = vrsqrt.f32 %v1330_v47  ;;  %vm1337_vm3 = vweird.f32 %v1330_v47 }
 0x728   :  { %s1449_s22 = spop %1448 }
 0x729   :  { %s1328_s23 = smul.f32 0.00390625, %s1449_s22 }
 0x72b   :  { %s1344_s24 = sadd.f32 1e-05, %s1328_s23 }
 0x72c   :  { %v1599_v2 = vpop.eup %1598 }
 0x72d   :  { %v1332_v40 = vmul.f32 %v1599_v2, %v1330_v47  ;;  %v1345_v53 = vstv %s1344_s24  ;;  %vm1338_vm2 = vweird.f32 %v1599_v2 }
 0x72e   :  { %1600 = vrsqrt.f32 %v1345_v53  ;;  %vm1339_vm4 = vmor %vm1337_vm3, %vm1338_vm2  ;;  %vm1352_vm6 = vweird.f32 %v1345_v53 }
 0x72f   :  { %v1333_v62 = vmul.f32 %v1599_v2, %v1332_v40 }
 0x731   :  { %v1334_v50 = vmul.f32 0.5, %v1333_v62 }
 0x733   :  { %v1335_v21 = vsub.f32 1.5, %v1334_v50 }
 0x734   :  { %v1601_v35 = vpop.eup %1600 }
 0x735   :  { %v1347_v30 = vmul.f32 %v1601_v35, %v1345_v53  ;;  %v1336_v4 = vmul.f32 %v1599_v2, %v1335_v21  ;;  %vm1353_vm5 = vweird.f32 %v1601_v35 }
 0x736   :  { %vm1354_vm7 = vmor %vm1352_vm6, %vm1353_vm5 }
 0x737   :  { %v1348_v57 = vmul.f32 %v1601_v35, %v1347_v30  ;;  %v1340_v58 = vsel %vm1339_vm4, %v1599_v2, %v1336_v4 }
 0x738   :  { %1450 = vpush %v1340_v58 }
 0x739   :  { %v1349_v42 = vmul.f32 0.5, %v1348_v57 }
 0x73b   :  { %v1350_v46 = vsub.f32 1.5, %v1349_v42 }
 0x73d   :  { %v1351_v14 = vmul.f32 %v1601_v35, %v1350_v46 }
 0x73f   :  { %v1355_v44 = vsel %vm1354_vm7, %v1601_v35, %v1351_v14 }
 0x740   :  { %1452 = vpush %v1355_v44 }
 0x769   :  { %s1451_s25 = spop %1450 }
 0x76a   :  { %v1342_v60 = vstv %s1451_s25 }
 0x76b   :  { %v1343_v52 = vmul.f32 %v2399_v17, %v1342_v60 }
 0x771   :  { %s1453_s26 = spop %1452 }
 0x772   :  { %v1357_v59 = vstv %s1453_s26 }
 0x773   :  { %v1358_v34 = vmul.f32 %v1357_v59, %v2402_v56 }
 0x775   :  { %v1359_v49 = vadd.f32 %v1358_v34, %v1343_v52 }
 0x777   :  { %v1360_v6 = vperm.slane %v1359_v49, 0 }
 0x779   :  { %v1361_v33 = vmul.f32 %v1360_v6, %v2410_v32 }
 0x77b   :  { %v1366_v29 = vmul.f32 %v1364_v22, %v1361_v33 }
 0x77d   :  { %v1371_v10 = vadd.f32 %v1369_v48, %v1366_v29 }
 0x77f   :  { %1372 = vst [vmem:[#allocation11] sm:$0xf] %v1371_v10 }
 0x780   :  { %1383 = dma.vmem_to_hbm [thread:$0]  %s1379_s28, 64, %s1381_s1, [#allocation4]  }
 0x781   :  { %1753 = dma.done.wait [#allocation4], 64  }
 0x782   :  { %1754 = vsyncadd [#allocation4], 4294967232 }
 0x783   :  { %1388 = vsyncpa [#allocation3], 1 }
 0x784   :  { %1389 = vsyncpa [#allocation6], 1 }
 0x785   :  { %1390 = vsyncpa [#allocation9], 1 }
 0x786   :  { %1391 = vsyncpa [#allocation4], 1 }

</bundles_post_ra>
